<compile_context>
chip_gen: v6e
topology: v6e:2x2x1
jax: 0.10.0
libtpu: 0.0.40
codegen_flags: <defaults>
</compile_context>

<pallas_src>
import math
import numpy as np
import jax
import jax.numpy as jnp
from jax import lax
from jax.experimental import pallas as pl
from jax.experimental.pallas import tpu as pltpu

# ----------------------- geometry (static configuration) --------------------
B = 2          # batch
A = 16         # number of projections
D = 128        # number of detector bins
H = W = 16     # reconstructed volume size
P = H * W      # flattened pixel count (lane-dense output)

VOL_SPACING = 1.0
DET_SPACING = 1.0
VOL_ORIGIN_X = -(W - 1) / 2.0 * VOL_SPACING
VOL_ORIGIN_Y = -(H - 1) / 2.0 * VOL_SPACING
DET_ORIGIN = -(D - 1) / 2.0 * DET_SPACING
SID = 200.0    # source-isocenter distance
SDD = 400.0    # source-detector distance
ANGULAR_RANGE = 2.0 * math.pi
BP_SCALE = math.pi * SID * SDD / A   # pyronn fan-backprojector normalization


# ------------------------------- kernel -------------------------------------
def _fanbeam_kernel(sino_ref, filt_ref, bp_ref, out_ref):
    # Stage 1: FFT-filtering as a circulant matmul on the MXU.
    # (B*A, D) @ (D, D) = (32,128)@(128,128); HIGHEST keeps the cancellation-
    # heavy filtered sinogram ~f32-accurate at negligible MXU cost.
    fsino = jnp.dot(sino_ref[...], filt_ref[...],
                    preferred_element_type=jnp.float32,
                    precision=lax.Precision.HIGHEST)            # (B*A, D) f32

    # Flatten (B*A, D) -> (B, A*D) with static slices + lane-aligned concat
    # (every chunk lands at a 128-lane / vreg boundary); no in-kernel reshape.
    rows = [fsino[i:i + 1, :] for i in range(B * A)]             # 32 x (1, D)
    fs_flat = jnp.concatenate(
        [jnp.concatenate(rows[b * A:(b + 1) * A], axis=1) for b in range(B)],
        axis=0)                                                  # (B, A*D)

    # Stage 2: fan-beam backprojection as ONE fused MXU contraction
    # (B, A*D) @ (A*D, P) with bf16 operands, f32 accumulation.
    out_ref[...] = jnp.dot(fs_flat.astype(jnp.bfloat16), bp_ref[...],
                           preferred_element_type=jnp.float32)   # (B, P) f32


# --------------------- host-side parameter preprocessing --------------------
def _filter_circulant(filter_freq):
    # Real circulant matrix M s.t. for real x:
    #   x @ M == ifft(fft(x, norm='ortho') * filter, norm='ortho').real
    eye = np.eye(D)
    M = np.real(np.fft.ifft(np.fft.fft(eye, axis=-1, norm="ortho")
                            * np.asarray(filter_freq)[None, :],
                            axis=-1, norm="ortho"))
    return M.astype(np.float32)


def _backprojection_matrix():
    # Static fan-beam geometry folded into a dense (A*D, H*W) matrix:
    #   out[p] = sum_{a,d} BP[a*D + d, p] * filtered_sino[a, d]
    # with linear detector interpolation, 1/dist^2 weighting, validity mask and
    # the pi*SID*SDD/A normalization baked in.  Pixel index p = iy*W + ix.
    theta = ANGULAR_RANGE * np.arange(A, dtype=np.float64) / A
    crx = np.cos(theta)[:, None]                      # (A, 1)
    cry = np.sin(theta)[:, None]
    px = np.arange(W, dtype=np.float64) * VOL_SPACING + VOL_ORIGIN_X
    py = np.arange(H, dtype=np.float64) * VOL_SPACING + VOL_ORIGIN_Y
    PX = np.tile(px, H)[None, :]                      # (1, P)
    PY = np.repeat(py, W)[None, :]                    # (1, P)
    dx = PX + SID * crx                               # (A, P)
    dy = PY + SID * cry
    d_ray = dx * crx + dy * cry                       # along central ray
    d_det = dy * crx - dx * cry                       # along detector direction
    s_idx = (SDD * d_det / d_ray - DET_ORIGIN) / DET_SPACING
    xf = np.floor(s_idx)
    frac = s_idx - xf
    xi = xf.astype(np.int64)
    valid = (xi >= 0) & (xi < D - 1)                  # pyronn interpolate1D mask
    xic = np.clip(xi, 0, D - 2)
    w = np.where(valid, BP_SCALE / (dx * dx + dy * dy), 0.0)
    bp = np.zeros((A, D, P), dtype=np.float64)
    a_idx = np.arange(A)[:, None]
    p_idx = np.arange(P)[None, :]
    np.add.at(bp, (a_idx, xic, p_idx), (1.0 - frac) * w)
    np.add.at(bp, (a_idx, xic + 1, p_idx), frac * w)
    return bp.reshape(A * D, P).astype(np.float32)    # (A*D, P)


# ------------------------------- wrapper -------------------------------------
def fan_beam_reconstruction(sinogram, filter_freq, redundancy_weights=None):
    # NOTE: redundancy weights accepted for API parity ONLY.  The reference
    # forward applies the FFT to `input` (not the weighted tensor), so they
    # never influence the output; short-scan weighting is NOT applied here.
    del redundancy_weights
    Bb, Aa, Dd = sinogram.shape
    assert (Bb, Aa, Dd) == (B, A, D)

    filt_mat = jnp.asarray(_filter_circulant(filter_freq))               # (D, D) f32, 64 KiB
    bp_mat = jnp.asarray(_backprojection_matrix(), dtype=jnp.bfloat16)   # (A*D, P) bf16, 1 MiB
    sino2d = sinogram.reshape(B * A, D)                                  # host-side reshape (free)

    out_flat = pl.pallas_call(
        _fanbeam_kernel,
        out_shape=jax.ShapeDtypeStruct((B, P), jnp.float32),
        # Single invocation (no grid): whole operands resident in VMEM
        # (~1.1 MiB total), one HBM->VMEM DMA, two MXU ops.
        in_specs=[
            pl.BlockSpec(memory_space=pltpu.MemorySpace.VMEM),   # sinogram (B*A, D)
            pl.BlockSpec(memory_space=pltpu.MemorySpace.VMEM),   # filter circulant (D, D)
            pl.BlockSpec(memory_space=pltpu.MemorySpace.VMEM),   # backprojection matrix (A*D, P)
        ],
        out_specs=pl.BlockSpec(memory_space=pltpu.MemorySpace.VMEM),
    )(sino2d, filt_mat, bp_mat)
    # Layout plumbing only: lane-dense (B, H*W) -> (B, H, W).
    return out_flat.reshape(Bb, H, W)


# -------------------------- pure-JAX reference --------------------------------
def _reference_forward(sinogram, filter_freq):
    fs = jnp.fft.fft(sinogram, axis=-1, norm="ortho") * filter_freq
    fsino = jnp.real(jnp.fft.ifft(fs, axis=-1, norm="ortho")).astype(jnp.float32)

    theta = ANGULAR_RANGE * jnp.arange(A, dtype=jnp.float32) / A
    crx = jnp.cos(theta)[:, None, None]
    cry = jnp.sin(theta)[:, None, None]
    px = (jnp.arange(W, dtype=jnp.float32) * VOL_SPACING + VOL_ORIGIN_X)[None, None, :]
    py = (jnp.arange(H, dtype=jnp.float32) * VOL_SPACING + VOL_ORIGIN_Y)[None, :, None]
    dx = px + SID * crx
    dy = py + SID * cry
    d_ray = dx * crx + dy * cry
    d_det = dy * crx - dx * cry
    s_idx = (SDD * d_det / d_ray - DET_ORIGIN) / DET_SPACING
    xf = jnp.floor(s_idx)
    frac = s_idx - xf
    xi = xf.astype(jnp.int32)
    valid = (xi >= 0) & (xi < D - 1)
    xi = jnp.clip(xi, 0, D - 2)
    idx_lo = jnp.broadcast_to(xi.reshape(1, A, H * W), (sinogram.shape[0], A, H * W))
    v_lo = jnp.take_along_axis(fsino, idx_lo, axis=2).reshape(-1, A, H, W)
    v_hi = jnp.take_along_axis(fsino, idx_lo + 1, axis=2).reshape(-1, A, H, W)
    val = v_lo * (1.0 - frac) + v_hi * frac
    dist2 = dx * dx + dy * dy
    contrib = jnp.where(valid, val / dist2, 0.0)
    return jnp.sum(contrib, axis=1) * BP_SCALE


# --------------------------------- main ---------------------------------------
if __name__ == "__main__":
    key = jax.random.PRNGKey(0)
    sinogram = jax.random.normal(key, (B, A, D), dtype=jnp.float32)

    # Deterministic ramp (Ram-Lak) filter in the frequency domain, shape (D,).
    freqs = np.fft.fftfreq(D, d=DET_SPACING)
    ramp_filter = (2.0 * np.abs(freqs)).astype(np.float32)

    # Short-scan redundancy weights (shape (A, D)); inert by reference semantics.
    redundancy_weights = np.ones((A, D), dtype=np.float32)

    out = fan_beam_reconstruction(sinogram, ramp_filter, redundancy_weights)
    out = jax.block_until_ready(out)

    ref = _reference_forward(sinogram, jnp.asarray(ramp_filter))
    err = float(jnp.max(jnp.abs(out - ref)))
    scale = float(jnp.max(jnp.abs(ref))) + 1.0
    if not np.isfinite(err) or err > 1e-2 * scale:
        raise AssertionError(f"kernel/reference mismatch: max abs err {err}")

    print("KERNEL_OK")
</pallas_src>

<mosaic_0001>
module attributes {stable_mosaic.version = 11 : i64} {
  func.func @_fanbeam_kernel(%arg0: memref<32x128xf32, #tpu.memory_space<vmem>>, %arg1: memref<128x128xf32, #tpu.memory_space<vmem>>, %arg2: memref<2048x256xbf16, #tpu.memory_space<vmem>>, %arg3: memref<2x256xf32, #tpu.memory_space<vmem>>) attributes {dimension_semantics = [], scalar_prefetch = 0 : i64, scratch_operands = 0 : i64, tpu.core_type = #tpu.core_type<tc>} {
    %c0 = arith.constant 0 : index
    %c0_0 = arith.constant 0 : index
    %0 = vector.load %arg0[%c0, %c0_0] : memref<32x128xf32, #tpu.memory_space<vmem>>, vector<32x128xf32>
    %c0_1 = arith.constant 0 : index
    %c0_2 = arith.constant 0 : index
    %1 = vector.load %arg1[%c0_1, %c0_2] : memref<128x128xf32, #tpu.memory_space<vmem>>, vector<128x128xf32>
    %cst = arith.constant dense<0.000000e+00> : vector<32x128xf32>
    %2 = tpu.matmul %0, %1, %cst {dimension_numbers = #tpu.dot_dimension_numbers<[1], [0], [0], [1], [0, 0, 1, 1], [], []>, precision = #tpu.contract_precision<fp32>} : vector<32x128xf32>, vector<128x128xf32>, vector<32x128xf32> -> vector<32x128xf32>
    %3 = vector.extract_strided_slice %2 {offsets = [0, 0], sizes = [1, 128], strides = [1, 1]} : vector<32x128xf32> to vector<1x128xf32>
    %4 = vector.extract_strided_slice %2 {offsets = [1, 0], sizes = [1, 128], strides = [1, 1]} : vector<32x128xf32> to vector<1x128xf32>
    %5 = vector.extract_strided_slice %2 {offsets = [2, 0], sizes = [1, 128], strides = [1, 1]} : vector<32x128xf32> to vector<1x128xf32>
    %6 = vector.extract_strided_slice %2 {offsets = [3, 0], sizes = [1, 128], strides = [1, 1]} : vector<32x128xf32> to vector<1x128xf32>
    %7 = vector.extract_strided_slice %2 {offsets = [4, 0], sizes = [1, 128], strides = [1, 1]} : vector<32x128xf32> to vector<1x128xf32>
    %8 = vector.extract_strided_slice %2 {offsets = [5, 0], sizes = [1, 128], strides = [1, 1]} : vector<32x128xf32> to vector<1x128xf32>
    %9 = vector.extract_strided_slice %2 {offsets = [6, 0], sizes = [1, 128], strides = [1, 1]} : vector<32x128xf32> to vector<1x128xf32>
    %10 = vector.extract_strided_slice %2 {offsets = [7, 0], sizes = [1, 128], strides = [1, 1]} : vector<32x128xf32> to vector<1x128xf32>
    %11 = vector.extract_strided_slice %2 {offsets = [8, 0], sizes = [1, 128], strides = [1, 1]} : vector<32x128xf32> to vector<1x128xf32>
    %12 = vector.extract_strided_slice %2 {offsets = [9, 0], sizes = [1, 128], strides = [1, 1]} : vector<32x128xf32> to vector<1x128xf32>
    %13 = vector.extract_strided_slice %2 {offsets = [10, 0], sizes = [1, 128], strides = [1, 1]} : vector<32x128xf32> to vector<1x128xf32>
    %14 = vector.extract_strided_slice %2 {offsets = [11, 0], sizes = [1, 128], strides = [1, 1]} : vector<32x128xf32> to vector<1x128xf32>
    %15 = vector.extract_strided_slice %2 {offsets = [12, 0], sizes = [1, 128], strides = [1, 1]} : vector<32x128xf32> to vector<1x128xf32>
    %16 = vector.extract_strided_slice %2 {offsets = [13, 0], sizes = [1, 128], strides = [1, 1]} : vector<32x128xf32> to vector<1x128xf32>
    %17 = vector.extract_strided_slice %2 {offsets = [14, 0], sizes = [1, 128], strides = [1, 1]} : vector<32x128xf32> to vector<1x128xf32>
    %18 = vector.extract_strided_slice %2 {offsets = [15, 0], sizes = [1, 128], strides = [1, 1]} : vector<32x128xf32> to vector<1x128xf32>
    %19 = vector.extract_strided_slice %2 {offsets = [16, 0], sizes = [1, 128], strides = [1, 1]} : vector<32x128xf32> to vector<1x128xf32>
    %20 = vector.extract_strided_slice %2 {offsets = [17, 0], sizes = [1, 128], strides = [1, 1]} : vector<32x128xf32> to vector<1x128xf32>
    %21 = vector.extract_strided_slice %2 {offsets = [18, 0], sizes = [1, 128], strides = [1, 1]} : vector<32x128xf32> to vector<1x128xf32>
    %22 = vector.extract_strided_slice %2 {offsets = [19, 0], sizes = [1, 128], strides = [1, 1]} : vector<32x128xf32> to vector<1x128xf32>
    %23 = vector.extract_strided_slice %2 {offsets = [20, 0], sizes = [1, 128], strides = [1, 1]} : vector<32x128xf32> to vector<1x128xf32>
    %24 = vector.extract_strided_slice %2 {offsets = [21, 0], sizes = [1, 128], strides = [1, 1]} : vector<32x128xf32> to vector<1x128xf32>
    %25 = vector.extract_strided_slice %2 {offsets = [22, 0], sizes = [1, 128], strides = [1, 1]} : vector<32x128xf32> to vector<1x128xf32>
    %26 = vector.extract_strided_slice %2 {offsets = [23, 0], sizes = [1, 128], strides = [1, 1]} : vector<32x128xf32> to vector<1x128xf32>
    %27 = vector.extract_strided_slice %2 {offsets = [24, 0], sizes = [1, 128], strides = [1, 1]} : vector<32x128xf32> to vector<1x128xf32>
    %28 = vector.extract_strided_slice %2 {offsets = [25, 0], sizes = [1, 128], strides = [1, 1]} : vector<32x128xf32> to vector<1x128xf32>
    %29 = vector.extract_strided_slice %2 {offsets = [26, 0], sizes = [1, 128], strides = [1, 1]} : vector<32x128xf32> to vector<1x128xf32>
    %30 = vector.extract_strided_slice %2 {offsets = [27, 0], sizes = [1, 128], strides = [1, 1]} : vector<32x128xf32> to vector<1x128xf32>
    %31 = vector.extract_strided_slice %2 {offsets = [28, 0], sizes = [1, 128], strides = [1, 1]} : vector<32x128xf32> to vector<1x128xf32>
    %32 = vector.extract_strided_slice %2 {offsets = [29, 0], sizes = [1, 128], strides = [1, 1]} : vector<32x128xf32> to vector<1x128xf32>
    %33 = vector.extract_strided_slice %2 {offsets = [30, 0], sizes = [1, 128], strides = [1, 1]} : vector<32x128xf32> to vector<1x128xf32>
    %34 = vector.extract_strided_slice %2 {offsets = [31, 0], sizes = [1, 128], strides = [1, 1]} : vector<32x128xf32> to vector<1x128xf32>
    %35 = tpu.concatenate %3, %4, %5, %6, %7, %8, %9, %10, %11, %12, %13, %14, %15, %16, %17, %18 in 1 : vector<1x128xf32>, vector<1x128xf32>, vector<1x128xf32>, vector<1x128xf32>, vector<1x128xf32>, vector<1x128xf32>, vector<1x128xf32>, vector<1x128xf32>, vector<1x128xf32>, vector<1x128xf32>, vector<1x128xf32>, vector<1x128xf32>, vector<1x128xf32>, vector<1x128xf32>, vector<1x128xf32>, vector<1x128xf32> -> vector<1x2048xf32>
    %36 = tpu.concatenate %19, %20, %21, %22, %23, %24, %25, %26, %27, %28, %29, %30, %31, %32, %33, %34 in 1 : vector<1x128xf32>, vector<1x128xf32>, vector<1x128xf32>, vector<1x128xf32>, vector<1x128xf32>, vector<1x128xf32>, vector<1x128xf32>, vector<1x128xf32>, vector<1x128xf32>, vector<1x128xf32>, vector<1x128xf32>, vector<1x128xf32>, vector<1x128xf32>, vector<1x128xf32>, vector<1x128xf32>, vector<1x128xf32> -> vector<1x2048xf32>
    %37 = tpu.concatenate %35, %36 in 0 : vector<1x2048xf32>, vector<1x2048xf32> -> vector<2x2048xf32>
    %38 = arith.truncf %37 : vector<2x2048xf32> to vector<2x2048xbf16>
    %c0_3 = arith.constant 0 : index
    %c0_4 = arith.constant 0 : index
    %39 = vector.load %arg2[%c0_3, %c0_4] : memref<2048x256xbf16, #tpu.memory_space<vmem>>, vector<2048x256xbf16>
    %cst_5 = arith.constant dense<0.000000e+00> : vector<2x256xf32>
    %40 = tpu.matmul %38, %39, %cst_5 {dimension_numbers = #tpu.dot_dimension_numbers<[1], [0], [0], [1], [0, 0, 1, 1], [], []>} : vector<2x2048xbf16>, vector<2048x256xbf16>, vector<2x256xf32> -> vector<2x256xf32>
    %c0_6 = arith.constant 0 : index
    %c0_7 = arith.constant 0 : index
    %41 = vector.load %arg3[%c0_6, %c0_7] : memref<2x256xf32, #tpu.memory_space<vmem>>, vector<2x256xf32>
    tpu.vector_store %arg3[%c0_6, %c0_7], %40 {strides = array<i32>} : memref<2x256xf32, #tpu.memory_space<vmem>>, vector<2x256xf32>,
    return
  }
}

</mosaic_0001>

<bundles_post_ra>
// kernel: tpu_custom_call.1
= control target key start
LH: loop header
LB: loop body
LE: loop exit
PB: predicated region body
PF: predicated region fallthrough
CT: control target
= control target key end

     0   :  { %8 = vsyncpa [#allocation3], 0  ;;  %s4433_s0 = inlined_call_operand.hbm [shape: f32[32,128], index: 0, kind: input, shape index: {}]   ;;  %s4434_s1 = inlined_call_operand.hbm [shape: f32[128,128], index: 1, kind: input, shape index: {}]   ;;  %s4435_s2 = inlined_call_operand.hbm [shape: bf16[2048,256], index: 2, kind: input, shape index: {}]   ;;  %s4436_s3 = inlined_call_operand.hbm [shape: f32[2,256], index: 3, kind: output, shape index: {}]  }
   0x1   :  { %9 = vsyncpa [#allocation6], 0 }
   0x2   :  { %10 = vsyncpa [#allocation4], 0  ;;  %s3940_s12 = smov [#allocation5]   ;;  %s3941_s14 = smov [#allocation2]  }
   0x3   :  { %s28_s13 = sshll.u32 %s3940_s12, 4  ;;  %s16_s15 = sshll.u32 %s3941_s14, 4  ;;  %s29_s13 = int_to_ptr.vmem [resolvable:$true] %s28_s13  ;;  %s17_s15 = int_to_ptr.vmem [resolvable:$true] %s16_s15 }
   0x4   :  { %s3862_s16 = scalar_lea.vmem %s29_s13, 2048  ;;  %p3867_p1 = scmp.lt.s32.totalorder %s29_s13, %s29_s13 }
   0x5   :  { %p3863_p0 = scmp.ne.s32.totalorder %s29_s13, %s3862_s16  ;;  %p3868_p2 = scmp.lt.s32.totalorder %s3862_s16, %s3862_s16 }
   0x7   :  { %p3869_p3 = por %p3868_p2, %p3867_p1 }
   0x9   :  { %p3870_p4 = pnand %p3869_p3, %p3863_p0 }
   0xb   :  { %3873 = shalt.err (!%p3870_p4)
}
   0xc   :  { %s3942_s17 = smov 128   ;;  %s3943_s18 = smov 8  }
   0xd   :  { %34 = dma.hbm_to_vmem [thread:$0]  %s4434_s1, 2048, %s29_s13, [#allocation6], %s3942_s17, %s3942_s17, %s3943_s18  }
   0xe   :  { %s3882_s21 = scalar_lea.vmem %s17_s15, 512  ;;  %p3887_p6 = scmp.lt.s32.totalorder %s17_s15, %s17_s15 }
   0xf   :  { %p3883_p5 = scmp.ne.s32.totalorder %s17_s15, %s3882_s21  ;;  %p3888_p7 = scmp.lt.s32.totalorder %s3882_s21, %s3882_s21 }
  0x11   :  { %p3889_p8 = por %p3888_p7, %p3887_p6 }
  0x13   :  { %p3890_p9 = pnand %p3889_p8, %p3883_p5 }
  0x15   :  { %3893 = shalt.err (!%p3890_p9)
}
  0x16   :  { %22 = dma.hbm_to_vmem [thread:$0]  %s4433_s0, 512, %s17_s15, [#allocation3], %s3942_s17, %s3942_s17, %s3943_s18  }
  0x17   :  { %s3944_s24 = smov [#allocation7]  }
  0x18   :  { %s40_s25 = sshll.u32 %s3944_s24, 4  ;;  %s41_s25 = int_to_ptr.vmem [resolvable:$true] %s40_s25 }
  0x19   :  { %s3902_s26 = scalar_lea.vmem %s41_s25, 32768  ;;  %p3907_p11 = scmp.lt.s32.totalorder %s41_s25, %s41_s25 }
  0x1a   :  { %p3903_p10 = scmp.ne.s32.totalorder %s41_s25, %s3902_s26  ;;  %p3908_p12 = scmp.lt.s32.totalorder %s3902_s26, %s3902_s26 }
  0x1c   :  { %p3909_p13 = por %p3908_p12, %p3907_p11 }
  0x1e   :  { %p3910_p0 = pnand %p3909_p13, %p3903_p10 }
  0x20   :  { %3913 = shalt.err (!%p3910_p0)
}
  0x21   :  { %46 = dma.hbm_to_vmem [thread:$0]  %s4435_s2, 32768, %s41_s25, [#allocation6], %s3942_s17, %s3942_s17, %s3943_s18  }
  0x22   :  { %3934 = dma.done.wait [#allocation3], 512  }
  0x23   :  { %3935 = vsyncadd [#allocation3], 4294966784 }
  0x24   :  { %3936 = dma.done.wait [#allocation6], 34816  }
  0x25   :  { %3937 = vsyncadd [#allocation6], 4294932480  ;;  %v75_v0 = vld [vmem:[#allocation5 + $0x78] sm:$0xff]  ;;  %v74_v1 = vld [vmem:[#allocation5 + $0x70] sm:$0xff]  ;;  %vm922_vm0 = vcmask 1040384   ;;  %s3945_s0 = smov [#allocation8]  }
  0x26   :  { %v73_v2 = vld [vmem:[#allocation5 + $0x68] sm:$0xff]  ;;  %v3975_v3 = vand.u32 4294901760, %v75_v0  ;;  %v3977_v4 = vand.u32 4294901760, %v74_v1  ;;  %v72_v6 = vld [vmem:[#allocation5 + $0x60] sm:$0xff]  ;;  %v71_v7 = vld [vmem:[#allocation5 + $0x58] sm:$0xff]  ;;  %s2837_s2 = sshll.u32 %s3945_s0, 4  ;;  %s2838_s2 = int_to_ptr.vmem [resolvable:$true] %s2837_s2 }
  0x27   :  { %v3979_v5 = vand.u32 4294901760, %v73_v2  ;;  %v70_v8 = vld [vmem:[#allocation5 + $0x50] sm:$0xff]  ;;  %v3981_v9 = vand.u32 4294901760, %v72_v6  ;;  %v3983_v10 = vand.u32 4294901760, %v71_v7  ;;  %v69_v12 = vld [vmem:[#allocation5 + $0x48] sm:$0xff]  ;;  %v68_v13 = vld [vmem:[#allocation5 + $0x40] sm:$0xff]  ;;  %p3919_p2 = scmp.lt.s32.totalorder %s2838_s2, %s2838_s2 }
  0x28   :  { %v3985_v11 = vand.u32 4294901760, %v70_v8  ;;  %3236 = vmatprep.subr.mxu0 %v3975_v3  ;;  %v3989_v14 = vsub.f32 %v75_v0, %v3975_v3  ;;  %v3992_v15 = vsub.f32 %v74_v1, %v3977_v4  ;;  %v3994_v16 = vand.u32 4294901760, %v69_v12  ;;  %v67_v18 = vld [vmem:[#allocation5 + $0x38] sm:$0xff]  ;;  %v66_v25 = vld [vmem:[#allocation5 + $0x30] sm:$0xff]  ;;  %v65_v30 = vld [vmem:[#allocation5 + $0x28] sm:$0xff]  ;;  %s3914_s28 = scalar_lea.vmem %s2838_s2, 64 }
  0x29   :  { %v3997_v17 = vsub.f32 %v73_v2, %v3979_v5  ;;  %3237 = vmatpush3.msra.mxu0 %v3975_v3  ;;  %v4001_v19 = vsub.f32 %v72_v6, %v3981_v9  ;;  %v4004_v20 = vsub.f32 %v71_v7, %v3983_v10  ;;  %v4016_v24 = vand.u32 4294901760, %v68_v13  ;;  %v64_v40 = vld [vmem:[#allocation5 + $0x20] sm:$0xff]  ;;  %v63_v44 = vld [vmem:[#allocation5 + $0x18] sm:$0xff]  ;;  %v57_v49 = vld [vmem:[#allocation2 + $0x8] sm:$0xff]  ;;  %p3915_p1 = scmp.ne.s32.totalorder %s2838_s2, %s3914_s28  ;;  %p3920_p3 = scmp.lt.s32.totalorder %s3914_s28, %s3914_s28 }
  0x2a   :  { %3238 = vmatprep.subr.mxu0 %v3977_v4  ;;  %v4008_v21 = vand.u32 4294901760, %v3989_v14  ;;  %v4011_v22 = vand.u32 4294901760, %v3992_v15  ;;  %v4022_v27 = vand.u32 4294901760, %v67_v18  ;;  %v4028_v29 = vsub.f32 %v70_v8, %v3985_v11  ;;  %v56_v45 = vld [vmem:[#allocation2] sm:$0xff]  ;;  %v62_v54 = vld [vmem:[#allocation5 + $0x10] sm:$0xff]  ;;  %v61_v60 = vld [vmem:[#allocation5 + $0x8] sm:$0xff] }
  0x2b   :  { %v4014_v23 = vand.u32 4294901760, %v3997_v17  ;;  %3239 = vmatpush3.msra.mxu0 %v3977_v4  ;;  %v4020_v26 = vand.u32 4294901760, %v4001_v19  ;;  %v4025_v28 = vand.u32 4294901760, %v4004_v20  ;;  %v4038_v34 = vsub.f32 %v69_v12, %v3994_v16  ;;  %v60_v6 = vld [vmem:[#allocation5] sm:$0xff]  ;;  %p3921_p4 = por %p3920_p3, %p3919_p2 }
  0x2c   :  { %3240 = vmatprep.subr.mxu0 %v3979_v5  ;;  %v201_v31 = vsub.f32 %v3989_v14, %v4008_v21  ;;  %v208_v32 = vsub.f32 %v3992_v15, %v4011_v22  ;;  %v4041_v35 = vand.u32 4294901760, %v66_v25  ;;  %v4047_v39 = vand.u32 4294901760, %v4028_v29 }
  0x2d   :  { %v215_v33 = vsub.f32 %v3997_v17, %v4014_v23  ;;  %3241 = vmatpush3.msra.mxu0 %v3979_v5  ;;  %v222_v38 = vsub.f32 %v4001_v19, %v4020_v26  ;;  %v229_v41 = vsub.f32 %v4004_v20, %v4025_v28  ;;  %v4053_v42 = vand.u32 4294901760, %v4038_v34  ;;  %p3922_p5 = pnand %p3921_p4, %p3915_p1 }
  0x2e   :  { %3242 = vmatprep.subr.mxu0 %v3981_v9  ;;  %v202_v36 = vand.u32 4294901760, %v201_v31  ;;  %v209_v37 = vand.u32 4294901760, %v208_v32  ;;  %v4056_v43 = vsub.f32 %v68_v13, %v4016_v24  ;;  %v4059_v47 = vand.u32 4294901760, %v65_v30 }
  0x2f   :  { %3243 = vmatpush3.msra.mxu0 %v3981_v9  ;;  %v216_v46 = vand.u32 4294901760, %v215_v33  ;;  %v4062_v48 = vsub.f32 %v67_v18, %v4022_v27  ;;  %v4065_v50 = vand.u32 4294901760, %v64_v40  ;;  %v223_v51 = vand.u32 4294901760, %v222_v38 }
  0x30   :  { %3244 = vmatprep.subr.mxu0 %v3983_v10  ;;  %3274 = vmatprep.subr.mxu1 %v202_v36  ;;  %v236_v52 = vsub.f32 %v4028_v29, %v4047_v39  ;;  %v4071_v53 = vand.u32 4294901760, %v4056_v43  ;;  %v4074_v55 = vsub.f32 %v66_v25, %v4041_v35  ;;  %v230_v56 = vand.u32 4294901760, %v229_v41 }
  0x31   :  { %3245 = vmatpush3.msra.mxu0 %v3983_v10  ;;  %3275 = vmatpush3.msra.mxu1 %v202_v36  ;;  %v243_v57 = vsub.f32 %v4038_v34, %v4053_v42  ;;  %v4080_v58 = vand.u32 4294901760, %v63_v44  ;;  %v4083_v59 = vand.u32 4294901760, %v4062_v48  ;;  %v4086_v61 = vsub.f32 %v65_v30, %v4059_v47 }
  0x32   :  { %3246 = vmatprep.subr.mxu0 %v3985_v11  ;;  %3276 = vmatprep.subr.mxu1 %v209_v37  ;;  %v4088_v62 = vand.u32 4294901760, %v56_v45  ;;  %v4091_v63 = vand.u32 4294901760, %v57_v49  ;;  %v237_v0 = vand.u32 4294901760, %v236_v52  ;;  %v250_v1 = vsub.f32 %v4056_v43, %v4071_v53 }
  0x33   :  { %3247 = vmatpush3.msra.mxu0 %v3985_v11  ;;  %3277 = vmatpush3.msra.mxu1 %v209_v37  ;;  %v4097_v2 = vand.u32 4294901760, %v4074_v55  ;;  %v4100_v7 = vsub.f32 %v64_v40, %v4065_v50  ;;  %v244_v8 = vand.u32 4294901760, %v243_v57  ;;  %v4103_v12 = vand.u32 4294901760, %v62_v54 }
  0x34   :  { %3248 = vmatprep.subr.mxu0 %v3994_v16  ;;  %3278 = vmatprep.subr.mxu1 %v216_v46  ;;  %v257_v13 = vsub.f32 %v4062_v48, %v4083_v59  ;;  %v4109_v18 = vand.u32 4294901760, %v4086_v61  ;;  %v4112_v25 = vsub.f32 %v56_v45, %v4088_v62  ;;  %v4115_v30 = vsub.f32 %v63_v44, %v4080_v58 }
  0x35   :  { %3249 = vmatpush3.msra.mxu0 %v3994_v16  ;;  %3279 = vmatpush3.msra.mxu1 %v216_v46  ;;  %v4118_v31 = vand.u32 4294901760, %v61_v60  ;;  %v4121_v32 = vsub.f32 %v57_v49, %v4091_v63  ;;  %v251_v33 = vand.u32 4294901760, %v250_v1  ;;  %v264_v36 = vsub.f32 %v4074_v55, %v4097_v2 }
  0x36   :  { %3250 = vmatprep.subr.mxu0 %v4016_v24  ;;  %3280 = vmatprep.subr.mxu1 %v223_v51  ;;  %v4127_v37 = vand.u32 4294901760, %v4100_v7  ;;  %v4130_v38 = vand.u32 4294901760, %v60_v6  ;;  %v4133_v40 = vsub.f32 %v62_v54, %v4103_v12  ;;  %v258_v41 = vand.u32 4294901760, %v257_v13 }
  0x37   :  { %3251 = vmatpush3.msra.mxu0 %v4016_v24  ;;  %3281 = vmatpush3.msra.mxu1 %v223_v51  ;;  %v271_v44 = vsub.f32 %v4086_v61, %v4109_v18  ;;  %v4438_v45 = vand.u32 4294901760, %v4112_v25  ;;  %v4140_v46 = vand.u32 4294901760, %v4115_v30  ;;  %v4437_v49 = vand.u32 4294901760, %v4121_v32 }
  0x38   :  { %3252 = vmatprep.subr.mxu0 %v4022_v27  ;;  %3282 = vmatprep.subr.mxu1 %v230_v56  ;;  %v4145_v51 = vsub.f32 %v61_v60, %v4118_v31  ;;  %v265_v52 = vand.u32 4294901760, %v264_v36  ;;  %v278_v54 = vsub.f32 %v4100_v7, %v4127_v37  ;;  %v4155_v57 = vsub.f32 %v60_v6, %v4130_v38 }
  0x39   :  { %3253 = vmatpush3.msra.mxu0 %v4022_v27  ;;  %3283 = vmatpush3.msra.mxu1 %v230_v56  ;;  %v4152_v56 = vand.u32 4294901760, %v4133_v40  ;;  %v272_v60 = vand.u32 4294901760, %v271_v44  ;;  %v285_v1 = vsub.f32 %v4115_v30, %v4140_v46 }
  0x3a   :  { %3254 = vmatprep.subr.mxu0 %v4041_v35  ;;  %3284 = vmatprep.subr.mxu1 %v237_v0  ;;  %v4168_v6 = vand.u32 4294901760, %v4145_v51  ;;  %v279_v13 = vand.u32 4294901760, %v278_v54  ;;  %v4175_v36 = vand.u32 4294901760, %v4155_v57 }
  0x3b   :  { %3255 = vmatpush3.msra.mxu0 %v4041_v35  ;;  %3285 = vmatpush3.msra.mxu1 %v237_v0  ;;  %v160_v0 = vsub.f32 %v4112_v25, %v4438_v45  ;;  %v286_v44 = vand.u32 4294901760, %v285_v1  ;;  %v58_v1 = vld [vmem:[#allocation2 + $0x10] sm:$0xff] }
  0x3c   :  { %3256 = vmatprep.subr.mxu0 %v4059_v47  ;;  %3286 = vmatprep.subr.mxu1 %v244_v8  ;;  %v299_v54 = vsub.f32 %v4145_v51, %v4168_v6  ;;  %v306_v45 = vsub.f32 %v4155_v57, %v4175_v36 }
  0x3d   :  { %3257 = vmatpush3.msra.mxu0 %v4059_v47  ;;  %3287 = vmatpush3.msra.mxu1 %v244_v8  ;;  %v170_v8 = vsub.f32 %v4121_v32, %v4437_v49 }
  0x3e   :  { %3258 = vmatprep.subr.mxu0 %v4065_v50  ;;  %3288 = vmatprep.subr.mxu1 %v251_v33 }
  0x3f   :  { %3259 = vmatpush3.msra.mxu0 %v4065_v50  ;;  %3289 = vmatpush3.msra.mxu1 %v251_v33  ;;  %v292_v33 = vsub.f32 %v4133_v40, %v4152_v56  ;;  %v171_v49 = vand.u32 4294901760, %v170_v8  ;;  %v59_v8 = vld [vmem:[#allocation2 + $0x18] sm:$0xff] }
  0x40   :  { %3260 = vmatprep.subr.mxu0 %v4080_v58  ;;  %3290 = vmatprep.subr.mxu1 %v258_v41 }
  0x41   :  { %3261 = vmatpush3.msra.mxu0 %v4080_v58  ;;  %3291 = vmatpush3.msra.mxu1 %v258_v41  ;;  %v161_v41 = vand.u32 4294901760, %v160_v0  ;;  %v307_v0 = vand.u32 4294901760, %v306_v45  ;;  %v3518_v45 = vld [vmem:[#allocation7 + $0xf0] ss:$8 sps:$4 sm:$0xff]  }
  0x42   :  { %3262 = vmatprep.subr.mxu0 %v4103_v12  ;;  %3292 = vmatprep.subr.mxu1 %v265_v52 }
  0x43   :  { %3263 = vmatpush3.msra.mxu0 %v4103_v12  ;;  %3293 = vmatpush3.msra.mxu1 %v265_v52  ;;  %v293_v52 = vand.u32 4294901760, %v292_v33  ;;  %v3530_v33 = vld [vmem:[#allocation7 + $0xd0] ss:$8 sps:$4 sm:$0xff]  }
  0x44   :  { %3264 = vmatprep.subr.mxu0 %v4118_v31  ;;  %3294 = vmatprep.subr.mxu1 %v272_v60 }
  0x45   :  { %3265 = vmatpush3.msra.mxu0 %v4118_v31  ;;  %3295 = vmatpush3.msra.mxu1 %v272_v60  ;;  %v300_v60 = vand.u32 4294901760, %v299_v54  ;;  %v3541_v54 = vld [vmem:[#allocation7 + $0x1c4] ss:$8 sps:$4 sm:$0xff]  }
  0x46   :  { %3266 = vmatprep.subr.mxu0 %v4130_v38  ;;  %3296 = vmatprep.subr.mxu1 %v279_v13 }
  0x47   :  { %3267 = vmatpush3.msra.mxu0 %v4130_v38  ;;  %3297 = vmatpush3.msra.mxu1 %v279_v13  ;;  %v3535_v13 = vld [vmem:[#allocation7 + $0x1d4] ss:$8 sps:$4 sm:$0xff]  }
  0x48   :  { %3268 = vmatprep.mubr.f32.mxu0 %v161_v41  ;;  %3298 = vmatprep.subr.mxu1 %v286_v44  ;;  %v3538_v41 = vld [vmem:[#allocation7 + $0xc4] ss:$8 sps:$4 sm:$0xff]  }
  0x49   :  { %3312 = vmatprep.subr.mxu0 %v3989_v14  ;;  %3269 = vmatmul.mubr.f32.vlgmr.msra.gmra.mxu0 %v171_v49  ;;  %v3526_v49 = vld [vmem:[#allocation7 + $0xe4] ss:$8 sps:$4 sm:$0xff]  }
  0x4a   :  { %3299 = vmatpush3.msra.mxu1 %v286_v44  ;;  %3313 = vmatpush3.msra.mxu0 %v3989_v14  ;;  %v4195_v14 = vand.u32 4294901760, %v58_v1  ;;  %v3536_v44 = vld [vmem:[#allocation7 + $0xc0] ss:$8 sps:$4 sm:$0xff]  }
  0x4b   :  { %3300 = vmatprep.subr.mxu1 %v293_v52  ;;  %3314 = vmatprep.subr.mxu0 %v3992_v15 }
  0x4c   :  { %3301 = vmatpush3.msra.mxu1 %v293_v52  ;;  %3315 = vmatpush3.msra.mxu0 %v3992_v15  ;;  %v4199_v15 = vand.u32 4294901760, %v59_v8  ;;  %v3539_v52 = vld [vmem:[#allocation7 + $0x1c0] ss:$8 sps:$4 sm:$0xff]  }
  0x4d   :  { %3302 = vmatprep.subr.mxu1 %v300_v60  ;;  %3316 = vmatprep.subr.mxu0 %v3997_v17 }
  0x4e   :  { %3303 = vmatpush3.msra.mxu1 %v300_v60  ;;  %3317 = vmatpush3.msra.mxu0 %v3997_v17  ;;  %v4208_v17 = vsub.f32 %v58_v1, %v4195_v14  ;;  %v3544_v60 = vld [vmem:[#allocation7 + $0xb4] ss:$8 sps:$4 sm:$0xff]  }
  0x4f   :  { %3304 = vmatprep.subr.mxu1 %v307_v0  ;;  %3318 = vmatprep.subr.mxu0 %v4001_v19  ;;  %v3547_v1 = vld [vmem:[#allocation7 + $0x1b4] ss:$8 sps:$4 sm:$0xff]  }
  0x50   :  { %3305 = vmatpush3.msra.mxu1 %v307_v0  ;;  %3306 = vmatprep.mubr.f32.mxu1 %v4088_v62  ;;  %v3542_v0 = vld [vmem:[#allocation7 + $0xb0] ss:$8 sps:$4 sm:$0xff]  }
  0x51   :  { %3319 = vmatpush3.msra.mxu0 %v4001_v19  ;;  %3307 = vmatmul.mubr.f32.vlgmr.msra.gmra.mxu1 %v4091_v63  ;;  %v4213_v19 = vsub.f32 %v59_v8, %v4199_v15  ;;  %v3545_v8 = vld [vmem:[#allocation7 + $0x1b0] ss:$8 sps:$4 sm:$0xff]  }
  0x52   :  { %3320 = vmatprep.subr.mxu0 %v4004_v20  ;;  %3350 = vmatprep.subr.mxu1 %v3975_v3 }
  0x53   :  { %3321 = vmatpush3.msra.mxu0 %v4004_v20  ;;  %3351 = vmatpush3.msra.mxu1 %v3975_v3  ;;  %v179_v20 = vand.u32 4294901760, %v4208_v17 }
  0x54   :  { %3322 = vmatprep.subr.mxu0 %v4028_v29  ;;  %3352 = vmatprep.subr.mxu1 %v3977_v4 }
  0x55   :  { %3323 = vmatpush3.msra.mxu0 %v4028_v29  ;;  %3353 = vmatpush3.msra.mxu1 %v3977_v4  ;;  %v189_v29 = vand.u32 4294901760, %v4213_v19 }
  0x56   :  { %3324 = vmatprep.subr.mxu0 %v4038_v34  ;;  %3354 = vmatprep.subr.mxu1 %v3979_v5 }
  0x57   :  { %3325 = vmatpush3.msra.mxu0 %v4038_v34  ;;  %3355 = vmatpush3.msra.mxu1 %v3979_v5  ;;  %v180_v34 = vsub.f32 %v4208_v17, %v179_v20 }
  0x58   :  { %3326 = vmatprep.subr.mxu0 %v4056_v43  ;;  %3356 = vmatprep.subr.mxu1 %v3981_v9 }
  0x59   :  { %3327 = vmatpush3.msra.mxu0 %v4056_v43  ;;  %3357 = vmatpush3.msra.mxu1 %v3981_v9  ;;  %v190_v43 = vsub.f32 %v4213_v19, %v189_v29 }
  0x5a   :  { %3328 = vmatprep.subr.mxu0 %v4062_v48  ;;  %3358 = vmatprep.subr.mxu1 %v3983_v10 }
  0x5b   :  { %3329 = vmatpush3.msra.mxu0 %v4062_v48  ;;  %3359 = vmatpush3.msra.mxu1 %v3983_v10  ;;  %v181_v48 = vand.u32 4294901760, %v180_v34  ;;  %v3559_v34 = vld [vmem:[#allocation7 + $0x194] ss:$8 sps:$4 sm:$0xff]  }
  0x5c   :  { %3330 = vmatprep.subr.mxu0 %v4074_v55  ;;  %3360 = vmatprep.subr.mxu1 %v3985_v11 }
  0x5d   :  { %3331 = vmatpush3.msra.mxu0 %v4074_v55  ;;  %3361 = vmatpush3.msra.mxu1 %v3985_v11  ;;  %v191_v55 = vand.u32 4294901760, %v190_v43  ;;  %v3557_v43 = vld [vmem:[#allocation7 + $0x190] ss:$8 sps:$4 sm:$0xff]  }
  0x5e   :  { %3332 = vmatprep.subr.mxu0 %v4086_v61  ;;  %3362 = vmatprep.subr.mxu1 %v3994_v16 }
  0x5f   :  { %3333 = vmatpush3.msra.mxu0 %v4086_v61  ;;  %3363 = vmatpush3.msra.mxu1 %v3994_v16  ;;  %v3500_v61 = vld [vmem:[#allocation7 + $0x20] ss:$8 sps:$4 sm:$0xff]  }
  0x60   :  { %3334 = vmatprep.subr.mxu0 %v4100_v7  ;;  %3364 = vmatprep.subr.mxu1 %v4016_v24 }
  0x61   :  { %3335 = vmatpush3.msra.mxu0 %v4100_v7  ;;  %3365 = vmatpush3.msra.mxu1 %v4016_v24  ;;  %v3508_v7 = vld [vmem:[#allocation7 + $0x14] ss:$8 sps:$4 sm:$0xff]  }
  0x62   :  { %3336 = vmatprep.subr.mxu0 %v4115_v30  ;;  %3366 = vmatprep.subr.mxu1 %v4022_v27 }
  0x63   :  { %3337 = vmatpush3.msra.mxu0 %v4115_v30  ;;  %3367 = vmatpush3.msra.mxu1 %v4022_v27  ;;  %v3512_v30 = vld [vmem:[#allocation7] ss:$8 sps:$4 sm:$0xff]  }
  0x64   :  { %3338 = vmatprep.subr.mxu0 %v4133_v40  ;;  %3368 = vmatprep.subr.mxu1 %v4041_v35 }
  0x65   :  { %3271 = vmatprep.mubr.f32.mxu0 %v181_v48  ;;  %3339 = vmatpush3.msra.mxu0 %v4133_v40  ;;  %v3523_v40 = vld [vmem:[#allocation7 + $0x1f4] ss:$8 sps:$4 sm:$0xff]   ;;  %v3560_v48 = vld [vmem:[#allocation7 + $0x80] ss:$8 sps:$4 sm:$0xff]  }
  0x66   :  { %3369 = vmatpush3.msra.mxu1 %v4041_v35  ;;  %3272 = vmatmul.mubr.f32.gmra.mxu0 %v191_v55  ;;  %v3562_v55 = vld [vmem:[#allocation7 + $0x84] ss:$8 sps:$4 sm:$0xff]  }
  0x67   :  { %3340 = vmatprep.subr.mxu0 %v4145_v51  ;;  %3370 = vmatprep.subr.mxu1 %v4059_v47 }
  0x68   :  { %3341 = vmatpush3.msra.mxu0 %v4145_v51  ;;  %3371 = vmatpush3.msra.mxu1 %v4059_v47  ;;  %v3529_v51 = vld [vmem:[#allocation7 + $0x1e4] ss:$8 sps:$4 sm:$0xff]  }
  0x69   :  { %3342 = vmatprep.subr.mxu0 %v4155_v57  ;;  %3372 = vmatprep.subr.mxu1 %v4065_v50 }
  0x6a   :  { %3343 = vmatpush3.msra.mxu0 %v4155_v57  ;;  %3344 = vmatprep.mubr.f32.mxu0 %v4112_v25  ;;  %v3527_v57 = vld [vmem:[#allocation7 + $0x1e0] ss:$8 sps:$4 sm:$0xff]  }
  0x6b   :  { %3373 = vmatpush3.msra.mxu1 %v4065_v50  ;;  %3309 = vmatprep.mubr.f32.mxu1 %v4195_v14 }
  0x6c   :  { %3345 = vmatmul.mubr.f32.vlgmr.msra.gmra.mxu0 %v4121_v32  ;;  %3374 = vmatprep.subr.mxu1 %v4080_v58 }
  0x6d   :  { %3388 = vmatprep.subr.mxu0 %v4008_v21  ;;  %3310 = vmatmul.mubr.f32.gmra.mxu1 %v4199_v15 }
  0x6e   :  { %3375 = vmatpush3.msra.mxu1 %v4080_v58  ;;  %3389 = vmatpush3.msra.mxu0 %v4008_v21  ;;  %v4439_v21 = vand.u32 4294901760, %v4112_v25  ;;  %v3509_v25 = vld [vmem:[#allocation7 + $0x110] ss:$8 sps:$4 sm:$0xff]  }
  0x6f   :  { %3376 = vmatprep.subr.mxu1 %v4103_v12  ;;  %3390 = vmatprep.subr.mxu0 %v4011_v22 }
  0x70   :  { %3347 = vmatprep.mubr.f32.mxu0 %v4208_v17  ;;  %3377 = vmatpush3.msra.mxu1 %v4103_v12  ;;  %v3553_v17 = vld [vmem:[#allocation7 + $0x1a4] ss:$8 sps:$4 sm:$0xff]  }
  0x71   :  { %3391 = vmatpush3.msra.mxu0 %v4011_v22  ;;  %3378 = vmatprep.subr.mxu1 %v4118_v31  ;;  %v4440_v22 = vand.u32 4294901760, %v4121_v32  ;;  %v3515_v32 = vld [vmem:[#allocation7 + $0x100] ss:$8 sps:$4 sm:$0xff]  }
  0x72   :  { %3348 = vmatmul.mubr.f32.gmra.mxu0 %v4213_v19  ;;  %3392 = vmatprep.subr.mxu0 %v4014_v23  ;;  %v3551_v19 = vld [vmem:[#allocation7 + $0x1a0] ss:$8 sps:$4 sm:$0xff]  }
  0x73   :  { %3379 = vmatpush3.msra.mxu1 %v4118_v31  ;;  %3393 = vmatpush3.msra.mxu0 %v4014_v23  ;;  %v3479_v23 = vld [vmem:[#allocation7 + $0x160] ss:$8 sps:$4 sm:$0xff]  }
  0x74   :  { %3380 = vmatprep.subr.mxu1 %v4130_v38  ;;  %3394 = vmatprep.subr.mxu0 %v4020_v26 }
  0x75   :  { %3381 = vmatpush3.msra.mxu1 %v4130_v38  ;;  %3382 = vmatprep.mubr.f32.mxu1 %v4439_v21  ;;  %v3563_v21 = vld [vmem:[#allocation7 + $0x180] ss:$8 sps:$4 sm:$0xff]  }
  0x76   :  { %3395 = vmatpush3.msra.mxu0 %v4020_v26  ;;  %3383 = vmatmul.mubr.f32.vlgmr.msra.gmra.mxu1 %v4440_v22  ;;  %v3484_v26 = vld [vmem:[#allocation7 + $0x54] ss:$8 sps:$4 sm:$0xff]   ;;  %v3565_v22 = vld [vmem:[#allocation7 + $0x184] ss:$8 sps:$4 sm:$0xff]  }
  0x77   :  { %3396 = vmatprep.subr.mxu0 %v4025_v28  ;;  %3426 = vmatprep.subr.mxu1 %v3975_v3 }
  0x78   :  { %3397 = vmatpush3.msra.mxu0 %v4025_v28  ;;  %3427 = vmatpush3.msra.mxu1 %v3975_v3  ;;  %v3470_v3 = vld [vmem:[#allocation7 + $0x70] ss:$8 sps:$4 sm:$0xff]   ;;  %v3487_v28 = vld [vmem:[#allocation7 + $0x154] ss:$8 sps:$4 sm:$0xff]  }
  0x79   :  { %3398 = vmatprep.subr.mxu0 %v4047_v39  ;;  %3428 = vmatprep.subr.mxu1 %v3977_v4 }
  0x7a   :  { %3385 = vmatprep.mubr.f32.mxu1 %v179_v20  ;;  %3399 = vmatpush3.msra.mxu0 %v4047_v39  ;;  %v3490_v39 = vld [vmem:[#allocation7 + $0x44] ss:$8 sps:$4 sm:$0xff]   ;;  %v3556_v20 = vld [vmem:[#allocation7 + $0x94] ss:$8 sps:$4 sm:$0xff]  }
  0x7b   :  { %3429 = vmatpush3.msra.mxu1 %v3977_v4  ;;  %3400 = vmatprep.subr.mxu0 %v4053_v42  ;;  %v3472_v4 = vld [vmem:[#allocation7 + $0x74] ss:$8 sps:$4 sm:$0xff]  }
  0x7c   :  { %3386 = vmatmul.mubr.f32.gmra.mxu1 %v189_v29  ;;  %3430 = vmatprep.subr.mxu1 %v3979_v5  ;;  %v3554_v29 = vld [vmem:[#allocation7 + $0x90] ss:$8 sps:$4 sm:$0xff]  }
  0x7d   :  { %3401 = vmatpush3.msra.mxu0 %v4053_v42  ;;  %3431 = vmatpush3.msra.mxu1 %v3979_v5  ;;  %v3475_v5 = vld [vmem:[#allocation7 + $0x174] ss:$8 sps:$4 sm:$0xff]   ;;  %v3491_v42 = vld [vmem:[#allocation7 + $0x140] ss:$8 sps:$4 sm:$0xff]  }
  0x7e   :  { %3402 = vmatprep.subr.mxu0 %v4071_v53  ;;  %3432 = vmatprep.subr.mxu1 %v3981_v9 }
  0x7f   :  { %3403 = vmatpush3.msra.mxu0 %v4071_v53  ;;  %3433 = vmatpush3.msra.mxu1 %v3981_v9  ;;  %v3478_v9 = vld [vmem:[#allocation7 + $0x64] ss:$8 sps:$4 sm:$0xff]   ;;  %v3496_v53 = vld [vmem:[#allocation7 + $0x34] ss:$8 sps:$4 sm:$0xff]  }
  0x80   :  { %3404 = vmatprep.subr.mxu0 %v4083_v59  ;;  %3434 = vmatprep.subr.mxu1 %v3983_v10 }
  0x81   :  { %3405 = vmatpush3.msra.mxu0 %v4083_v59  ;;  %3435 = vmatpush3.msra.mxu1 %v3983_v10  ;;  %v3473_v10 = vld [vmem:[#allocation7 + $0x170] ss:$8 sps:$4 sm:$0xff]   ;;  %v3499_v59 = vld [vmem:[#allocation7 + $0x134] ss:$8 sps:$4 sm:$0xff]  }
  0x82   :  { %3406 = vmatprep.subr.mxu0 %v4097_v2  ;;  %3436 = vmatprep.subr.mxu1 %v3985_v11 }
  0x83   :  { %3407 = vmatpush3.msra.mxu0 %v4097_v2  ;;  %3437 = vmatpush3.msra.mxu1 %v3985_v11  ;;  %v3476_v11 = vld [vmem:[#allocation7 + $0x60] ss:$8 sps:$4 sm:$0xff]   ;;  %v3505_v2 = vld [vmem:[#allocation7 + $0x124] ss:$8 sps:$4 sm:$0xff]  }
  0x84   :  { %3408 = vmatprep.subr.mxu0 %v4109_v18  ;;  %3438 = vmatprep.subr.mxu1 %v3994_v16 }
  0x85   :  { %3409 = vmatpush3.msra.mxu0 %v4109_v18  ;;  %3439 = vmatpush3.msra.mxu1 %v3994_v16  ;;  %v3481_v16 = vld [vmem:[#allocation7 + $0x164] ss:$8 sps:$4 sm:$0xff]   ;;  %v3511_v18 = vld [vmem:[#allocation7 + $0x114] ss:$8 sps:$4 sm:$0xff]  }
  0x86   :  { %3410 = vmatprep.subr.mxu0 %v4127_v37  ;;  %3440 = vmatprep.subr.mxu1 %v4016_v24 }
  0x87   :  { %3411 = vmatpush3.msra.mxu0 %v4127_v37  ;;  %3441 = vmatpush3.msra.mxu1 %v4016_v24  ;;  %v3482_v24 = vld [vmem:[#allocation7 + $0x50] ss:$8 sps:$4 sm:$0xff]   ;;  %v3517_v37 = vld [vmem:[#allocation7 + $0x104] ss:$8 sps:$4 sm:$0xff]  }
  0x88   :  { %3412 = vmatprep.subr.mxu0 %v4140_v46  ;;  %3442 = vmatprep.subr.mxu1 %v4022_v27 }
  0x89   :  { %3413 = vmatpush3.msra.mxu0 %v4140_v46  ;;  %3443 = vmatpush3.msra.mxu1 %v4022_v27  ;;  %v3485_v27 = vld [vmem:[#allocation7 + $0x150] ss:$8 sps:$4 sm:$0xff]  }
  0x8a   :  { %3414 = vmatprep.subr.mxu0 %v4152_v56  ;;  %3444 = vmatprep.subr.mxu1 %v4041_v35  ;;  %v3521_v46 = vld [vmem:[#allocation7 + $0x1f0] ss:$8 sps:$4 sm:$0xff]  }
  0x8b   :  { %3415 = vmatpush3.msra.mxu0 %v4152_v56  ;;  %3445 = vmatpush3.msra.mxu1 %v4041_v35  ;;  %v3488_v35 = vld [vmem:[#allocation7 + $0x40] ss:$8 sps:$4 sm:$0xff]  }
  0x8c   :  { %3416 = vmatprep.subr.mxu0 %v4168_v6  ;;  %3446 = vmatprep.subr.mxu1 %v4059_v47  ;;  %v3524_v56 = vld [vmem:[#allocation7 + $0xe0] ss:$8 sps:$4 sm:$0xff]  }
  0x8d   :  { %3417 = vmatpush3.msra.mxu0 %v4168_v6  ;;  %3447 = vmatpush3.msra.mxu1 %v4059_v47  ;;  %v3493_v47 = vld [vmem:[#allocation7 + $0x144] ss:$8 sps:$4 sm:$0xff]   ;;  %v3532_v6 = vld [vmem:[#allocation7 + $0xd4] ss:$8 sps:$4 sm:$0xff]  }
  0x8e   :  { %3418 = vmatprep.subr.mxu0 %v4175_v36  ;;  %3448 = vmatprep.subr.mxu1 %v4065_v50 }
  0x8f   :  { %3419 = vmatpush3.msra.mxu0 %v4175_v36  ;;  %3420 = vmatprep.mubr.f32.mxu0 %v4088_v62  ;;  %v3533_v36 = vld [vmem:[#allocation7 + $0x1d0] ss:$8 sps:$4 sm:$0xff]  }
  0x90   :  { %3449 = vmatpush3.msra.mxu1 %v4065_v50  ;;  %3421 = vmatmul.mubr.f32.vlgmr.msra.gmra.mxu0 %v4091_v63  ;;  %v3494_v50 = vld [vmem:[#allocation7 + $0x30] ss:$8 sps:$4 sm:$0xff]  }
  0x91   :  { %3450 = vmatprep.subr.mxu1 %v4080_v58  ;;  %3423 = vmatprep.mubr.f32.mxu0 %v4195_v14 }
  0x92   :  { %3451 = vmatpush3.msra.mxu1 %v4080_v58  ;;  %3458 = vmatprep.mubr.f32.mxu1 %v4088_v62  ;;  %v3497_v58 = vld [vmem:[#allocation7 + $0x130] ss:$8 sps:$4 sm:$0xff]   ;;  %v3502_v62 = vld [vmem:[#allocation7 + $0x24] ss:$8 sps:$4 sm:$0xff]  }
  0x93   :  { %3452 = vmatprep.subr.mxu1 %v4103_v12  ;;  %2491 = vmatprep.subr.bf16.mxu0 %v3472_v4  ;;  %v3571_v4 = vld [vmem:[#allocation7 + $0x374] ss:$8 sps:$4 sm:$0xff]  }
  0x94   :  { %3453 = vmatpush3.msra.mxu1 %v4103_v12  ;;  %3424 = vmatmul.mubr.f32.gmra.mxu0 %v4199_v15  ;;  %v3506_v12 = vld [vmem:[#allocation7 + $0x10] ss:$8 sps:$4 sm:$0xff]  }
  0x95   :  { %3454 = vmatprep.subr.mxu1 %v4118_v31  ;;  %2492 = vmatpush1.bf16.msra.mxu0 %v3470_v3  ;;  %v3568_v3 = vld [vmem:[#allocation7 + $0x274] ss:$8 sps:$4 sm:$0xff]  }
  0x96   :  { %3455 = vmatpush3.msra.mxu1 %v4118_v31  ;;  %2493 = vmatprep.subr.bf16.mxu0 %v3478_v9  ;;  %v3514_v31 = vld [vmem:[#allocation7 + $0x4] ss:$8 sps:$4 sm:$0xff]  }
  0x97   :  { %3456 = vmatprep.subr.mxu1 %v4130_v38 }
  0x98   :  { %3457 = vmatpush3.msra.mxu1 %v4130_v38  ;;  %v3520_v38 = vld [vmem:[#allocation7 + $0xf4] ss:$8 sps:$4 sm:$0xff]  }
  0x99   :  { %3459 = vmatmul.mubr.f32.vlgmr.msra.gmra.mxu1 %v4091_v63  ;;  %2532 = vmatprep.subr.bf16.mxu1 %v3475_v5  ;;  %v3503_v63 = vld [vmem:[#allocation7 + $0x120] ss:$8 sps:$4 sm:$0xff]  }
  0x9a   :  { %3461 = vmatprep.mubr.f32.mxu1 %v4195_v14  ;;  %2533 = vmatpush1.bf16.msra.mxu1 %v3473_v10  ;;  %v3550_v14 = vld [vmem:[#allocation7 + $0xa4] ss:$8 sps:$4 sm:$0xff]  }
  0x9b   :  { %2494 = vmatpush1.bf16.msra.mxu0 %v3476_v11  ;;  %2534 = vmatprep.subr.bf16.mxu1 %v3481_v16 }
  0x9c   :  { %2495 = vmatprep.subr.bf16.mxu0 %v3484_v26 }
  0x9d   :  { %3462 = vmatmul.mubr.f32.gmra.mxu1 %v4199_v15  ;;  %v3548_v15 = vld [vmem:[#allocation7 + $0xa0] ss:$8 sps:$4 sm:$0xff]  }
  0x9e   :  { %2535 = vmatpush1.bf16.msra.mxu1 %v3479_v23 }
  0x9f   :  { %2496 = vmatpush1.bf16.msra.mxu0 %v3482_v24  ;;  %2536 = vmatprep.subr.bf16.mxu1 %v3487_v28 }
  0xa0   :  { %2497 = vmatprep.subr.bf16.mxu0 %v3490_v39 }
  0xa2   :  { %2537 = vmatpush1.bf16.msra.mxu1 %v3485_v27 }
  0xa3   :  { %2498 = vmatpush1.bf16.msra.mxu0 %v3488_v35  ;;  %2538 = vmatprep.subr.bf16.mxu1 %v3493_v47 }
  0xa4   :  { %2499 = vmatprep.subr.bf16.mxu0 %v3496_v53 }
  0xa6   :  { %2539 = vmatpush1.bf16.msra.mxu1 %v3491_v42 }
  0xa7   :  { %2500 = vmatpush1.bf16.msra.mxu0 %v3494_v50  ;;  %2540 = vmatprep.subr.bf16.mxu1 %v3499_v59 }
  0xa8   :  { %2501 = vmatprep.subr.bf16.mxu0 %v3502_v62 }
  0xaa   :  { %2541 = vmatpush1.bf16.msra.mxu1 %v3497_v58 }
  0xab   :  { %2502 = vmatpush1.bf16.msra.mxu0 %v3500_v61  ;;  %2542 = vmatprep.subr.bf16.mxu1 %v3505_v2 }
  0xac   :  { %2503 = vmatprep.subr.bf16.mxu0 %v3508_v7 }
  0xae   :  { %2543 = vmatpush1.bf16.msra.mxu1 %v3503_v63 }
  0xaf   :  { %2504 = vmatpush1.bf16.msra.mxu0 %v3506_v12  ;;  %2544 = vmatprep.subr.bf16.mxu1 %v3511_v18 }
  0xb0   :  { %2505 = vmatprep.subr.bf16.mxu0 %v3514_v31 }
  0xb2   :  { %2545 = vmatpush1.bf16.msra.mxu1 %v3509_v25 }
  0xb3   :  { %2546 = vmatprep.subr.bf16.mxu1 %v3517_v37  ;;  %2506 = vmatpush1.bf16.msra.mxu0 %v3512_v30 }
  0xb4   :  { %2507 = vmatprep.subr.bf16.mxu0 %v3520_v38 }
  0xb6   :  { %2547 = vmatpush1.bf16.msra.mxu1 %v3515_v32 }
  0xb7   :  { %2548 = vmatprep.subr.bf16.mxu1 %v3523_v40  ;;  %2508 = vmatpush2.bf16.msra.mxu0 %v3518_v45 }
  0xb8   :  { %2509 = vmatprep.subr.bf16.mxu0 %v3526_v49 }
  0xba   :  { %2549 = vmatpush2.bf16.msra.mxu1 %v3521_v46 }
  0xbb   :  { %2550 = vmatprep.subr.bf16.mxu1 %v3529_v51  ;;  %2510 = vmatpush2.bf16.msra.mxu0 %v3524_v56 }
  0xbc   :  { %2511 = vmatprep.subr.bf16.mxu0 %v3532_v6 }
  0xbe   :  { %2551 = vmatpush2.bf16.msra.mxu1 %v3527_v57 }
  0xbf   :  { %2552 = vmatprep.subr.bf16.mxu1 %v3535_v13  ;;  %2512 = vmatpush2.bf16.msra.mxu0 %v3530_v33 }
  0xc0   :  { %2513 = vmatprep.subr.bf16.mxu0 %v3538_v41 }
  0xc2   :  { %2553 = vmatpush2.bf16.msra.mxu1 %v3533_v36 }
  0xc3   :  { %2514 = vmatpush2.bf16.msra.mxu0 %v3536_v44  ;;  %2554 = vmatprep.subr.bf16.mxu1 %v3541_v54 }
  0xc4   :  { %2515 = vmatprep.subr.bf16.mxu0 %v3544_v60 }
  0xc6   :  { %2555 = vmatpush2.bf16.msra.mxu1 %v3539_v52 }
  0xc7   :  { %2516 = vmatpush2.bf16.msra.mxu0 %v3542_v0  ;;  %2556 = vmatprep.subr.bf16.mxu1 %v3547_v1 }
  0xc8   :  { %2517 = vmatprep.subr.bf16.mxu0 %v3550_v14 }
  0xca   :  { %2557 = vmatpush2.bf16.msra.mxu1 %v3545_v8 }
  0xcb   :  { %2518 = vmatpush2.bf16.msra.mxu0 %v3548_v15  ;;  %2558 = vmatprep.subr.bf16.mxu1 %v3553_v17 }
  0xcc   :  { %2519 = vmatprep.subr.bf16.mxu0 %v3556_v20 }
  0xce   :  { %2559 = vmatpush2.bf16.msra.mxu1 %v3551_v19 }
  0xcf   :  { %2520 = vmatpush2.bf16.msra.mxu0 %v3554_v29  ;;  %2560 = vmatprep.subr.bf16.mxu1 %v3559_v34 }
  0xd0   :  { %2521 = vmatprep.subr.bf16.mxu0 %v3562_v55 }
  0xd2   :  { %2561 = vmatpush2.bf16.msra.mxu1 %v3557_v43 }
  0xd3   :  { %2522 = vmatpush2.bf16.msra.mxu0 %v3560_v48  ;;  %2562 = vmatprep.subr.bf16.mxu1 %v3565_v22 }
  0xd4   :  { %2573 = vmatprep.subr.bf16.mxu0 %v3568_v3 }
  0xd6   :  { %2563 = vmatpush2.bf16.msra.mxu1 %v3563_v21 }
  0xd7   :  { %2614 = vmatprep.subr.bf16.mxu1 %v3571_v4 }
 0x109   :  { %v3270_v5 = vpop.f32.mrf.mxu0 }
 0x10b   :  { %v163_v11 = vpop.f32.mrf.mxu0 }
 0x111   :  { %v3308_v9 = vpop.f32.mrf.mxu1 }
 0x112   :  { %v351_v10 = vadd.f32 %v3308_v9, %v3270_v5 }
 0x113   :  { %v344_v24 = vpop.f32.mrf.mxu1 }
 0x114   :  { %v345_v18 = vadd.f32 %v344_v24, %v163_v11  ;;  %v3566_v11 = vld [vmem:[#allocation7 + $0x270] ss:$8 sps:$4 sm:$0xff]  }
 0x126   :  { %v3273_v16 = vpop.f32.mrf.mxu0 }
 0x128   :  { %v183_v23 = vpop.f32.mrf.mxu0 }
 0x12c   :  { %v3346_v26 = vpop.f32.mrf.mxu0 }
 0x12d   :  { %v474_v27 = vadd.f32 %v3346_v26, %v351_v10  ;;  %v3311_v28 = vpop.f32.mrf.mxu1 }
 0x12e   :  { %v363_v35 = vadd.f32 %v3311_v28, %v3273_v16  ;;  %v466_v39 = vpop.f32.mrf.mxu0 }
 0x12f   :  { %v356_v50 = vpop.f32.mrf.mxu1  ;;  %v467_v32 = vadd.f32 %v466_v39, %v345_v18 }
 0x130   :  { %v357_v30 = vadd.f32 %v356_v50, %v183_v23 }
 0x132   :  { %v3349_v42 = vpop.f32.mrf.mxu0 }
 0x133   :  { %v488_v47 = vadd.f32 %v3349_v42, %v363_v35  ;;  %v3569_v35 = vld [vmem:[#allocation7 + $0x370] ss:$8 sps:$4 sm:$0xff]  }
 0x134   :  { %v480_v63 = vpop.f32.mrf.mxu0 }
 0x135   :  { %v481_v40 = vadd.f32 %v480_v63, %v357_v30 }
 0x136   :  { %v3384_v53 = vpop.f32.mrf.mxu1 }
 0x137   :  { %v585_v58 = vadd.f32 %v3384_v53, %v474_v27  ;;  %v3574_v53 = vld [vmem:[#allocation7 + $0x264] ss:$8 sps:$4 sm:$0xff]  }
 0x138   :  { %v576_v59 = vpop.f32.mrf.mxu1 }
 0x139   :  { %v577_v38 = vadd.f32 %v576_v59, %v467_v32  ;;  %v3580_v32 = vld [vmem:[#allocation7 + $0x254] ss:$8 sps:$4 sm:$0xff]  }
 0x13c   :  { %v3387_v61 = vpop.f32.mrf.mxu1 }
 0x13d   :  { %v601_v62 = vadd.f32 %v3387_v61, %v488_v47 }
 0x13e   :  { %v592_v37 = vpop.f32.mrf.mxu1 }
 0x13f   :  { %v593_v56 = vadd.f32 %v592_v37, %v481_v40  ;;  %v3583_v37 = vld [vmem:[#allocation7 + $0x354] ss:$8 sps:$4 sm:$0xff]  }
 0x150   :  { %v3422_v2 = vpop.f32.mrf.mxu0 }
 0x151   :  { %v726_v7 = vadd.f32 %v3422_v2, %v585_v58 }
 0x152   :  { %v719_v12 = vpop.f32.mrf.mxu0 }
 0x153   :  { %v720_v46 = vadd.f32 %v719_v12, %v577_v38 }
 0x154   :  { %v3425_v25 = vpop.f32.mrf.mxu0 }
 0x155   :  { %v738_v31 = vadd.f32 %v3425_v25, %v601_v62  ;;  %v3577_v62 = vld [vmem:[#allocation7 + $0x364] ss:$8 sps:$4 sm:$0xff]  }
 0x156   :  { %v731_v49 = vpop.f32.mrf.mxu0 }
 0x157   :  { %v732_v13 = vadd.f32 %v731_v49, %v593_v56 }
 0x159   :  { %v3460_v45 = vpop.f32.mrf.mxu1 }
 0x15a   :  { %v4355_v51 = vadd.f32 %v3460_v45, %v726_v7  ;;  %v3572_v7 = vld [vmem:[#allocation7 + $0x260] ss:$8 sps:$4 sm:$0xff]  }
 0x15b   :  { %v824_v57 = vpop.f32.mrf.mxu1 }
 0x15c   :  { %v825_v6 = vadd.f32 %v824_v57, %v720_v46  ;;  %v862_v36 = vrot.slane %v4355_v51, 1  ;;  %v866_v54 = vrot.slane %v4355_v51, 3  ;;  %v864_v52 = vrot.slane %v4355_v51, 2  ;;  %v3578_v57 = vld [vmem:[#allocation7 + $0x250] ss:$8 sps:$4 sm:$0xff]  }
 0x15d   :  { %v3463_v33 = vpop.f32.mrf.mxu1  ;;  %v870_v63 = vrot.slane %v4355_v51, 5  ;;  %v874_v2 = vrot.slane %v4355_v51, 7  ;;  %v868_v45 = vrot.slane %v4355_v51, 4  ;;  %v872_v49 = vrot.slane %v4355_v51, 6 }
 0x15e   :  { %v4358_v41 = vadd.f32 %v3463_v33, %v738_v31  ;;  %v847_v44 = vrot.slane %v825_v6, 1  ;;  %v851_v0 = vrot.slane %v825_v6, 3  ;;  %v849_v1 = vrot.slane %v825_v6, 2  ;;  %v3575_v31 = vld [vmem:[#allocation7 + $0x360] ss:$8 sps:$4 sm:$0xff]  }
 0x15f   :  { %v836_v60 = vpop.f32.mrf.mxu1  ;;  %v855_v8 = vrot.slane %v825_v6, 5  ;;  %v859_v14 = vrot.slane %v825_v6, 7  ;;  %v853_v17 = vrot.slane %v825_v6, 4  ;;  %v857_v19 = vrot.slane %v825_v6, 6  ;;  %v3586_v33 = vld [vmem:[#allocation7 + $0x244] ss:$8 sps:$4 sm:$0xff]  }
 0x160   :  { %v837_v15 = vadd.f32 %v836_v60, %v732_v13  ;;  %v4364_v20 = vsel %vm922_vm0, %v862_v36, %v4358_v41  ;;  %v2855_v29 = vrot.slane %v4358_v41, 10  ;;  %v891_v34 = vrot.slane %v4358_v41, 7  ;;  %v3581_v13 = vld [vmem:[#allocation7 + $0x350] ss:$8 sps:$4 sm:$0xff]  }
 0x161   :  { %v2854_v43 = vrot.slane %v4358_v41, 9  ;;  %v2857_v48 = vrot.slane %v4358_v41, 12  ;;  %v2856_v46 = vrot.slane %v4358_v41, 11  ;;  %v2858_v56 = vrot.slane %v4358_v41, 13  ;;  %v3592_v41 = vld [vmem:[#allocation7 + $0x234] ss:$8 sps:$4 sm:$0xff]  }
 0x162   :  { %v924_v55 = vsel %vm922_vm0, %v847_v44, %v837_v15  ;;  %v883_v21 = vrot.slane %v837_v15, 7  ;;  %v2849_v22 = vrot.slane %v837_v15, 10  ;;  %v2848_v3 = vrot.slane %v837_v15, 9  ;;  %v3589_v44 = vld [vmem:[#allocation7 + $0x344] ss:$8 sps:$4 sm:$0xff]  }
 0x163   :  { %v940_v4 = vpack.c.bf16 %v924_v55, %v924_v55  ;;  %v2851_v5 = vrot.slane %v837_v15, 12  ;;  %v2850_v9 = vrot.slane %v837_v15, 11  ;;  %v2852_v10 = vrot.slane %v837_v15, 13  ;;  %v3590_v60 = vld [vmem:[#allocation7 + $0x230] ss:$8 sps:$4 sm:$0xff]  }
 0x164   :  { %v923_v16 = vsel %vm922_vm0, %v825_v6, %v883_v21  ;;  %v926_v23 = vsel %vm922_vm0, %v851_v0, %v2849_v22  ;;  %v925_v24 = vsel %vm922_vm0, %v849_v1, %v2848_v3  ;;  %v898_v26 = vrot.slane %v883_v21, 7  ;;  %v3593_v0 = vld [vmem:[#allocation7 + $0x330] ss:$8 sps:$4 sm:$0xff]   ;;  %v3598_v1 = vld [vmem:[#allocation7 + $0x224] ss:$8 sps:$4 sm:$0xff]  }
 0x165   :  { %2523 = vmatprep.mubr.bf16.mxu0 %v940_v4  ;;  %v939_v27 = vpack.c.bf16 %v923_v16, %v923_v16  ;;  %v942_v28 = vpack.c.bf16 %v926_v23, %v926_v23  ;;  %v941_v39 = vpack.c.bf16 %v925_v24, %v925_v24  ;;  %v928_v42 = vsel %vm922_vm0, %v855_v8, %v2851_v5  ;;  %v3601_v8 = vld [vmem:[#allocation7 + $0x324] ss:$8 sps:$4 sm:$0xff]   ;;  %v3599_v15 = vld [vmem:[#allocation7 + $0x320] ss:$8 sps:$4 sm:$0xff]   ;;  %v3616_v22 = vld [vmem:[#allocation7 + $0x2f4] ss:$8 sps:$4 sm:$0xff]  }
 0x166   :  { %v944_v47 = vpack.c.bf16 %v928_v42, %v928_v42  ;;  %v930_v50 = vsel %vm922_vm0, %v859_v14, %v898_v26  ;;  %v4377_v58 = vsel %vm922_vm0, %v853_v17, %v2850_v9  ;;  %v4380_v59 = vsel %vm922_vm0, %v857_v19, %v2852_v10  ;;  %v3596_v14 = vld [vmem:[#allocation7 + $0x220] ss:$8 sps:$4 sm:$0xff]   ;;  %v3604_v17 = vld [vmem:[#allocation7 + $0x214] ss:$8 sps:$4 sm:$0xff]   ;;  %v3614_v4 = vld [vmem:[#allocation7 + $0x2f0] ss:$8 sps:$4 sm:$0xff]  }
 0x167   :  { %2524 = vmatmul.mubr.bf16.vlgmr.msra.gmra.mxu0 %v939_v27  ;;  %2564 = vmatprep.mubr.bf16.mxu1 %v942_v28  ;;  %v946_v61 = vpack.c.bf16 %v930_v50, %v930_v50  ;;  %v4385_v12 = vsel %vm922_vm0, %v866_v54, %v2855_v29  ;;  %v4389_v18 = vsel %vm922_vm0, %v4355_v51, %v891_v34  ;;  %v905_v30 = vrot.slane %v891_v34, 7  ;;  %v3584_v54 = vld [vmem:[#allocation7 + $0x240] ss:$8 sps:$4 sm:$0xff]   ;;  %v3607_v19 = vld [vmem:[#allocation7 + $0x314] ss:$8 sps:$4 sm:$0xff]  }
 0x168   :  { %2574 = vmatpush1.bf16.msra.mxu0 %v3566_v11  ;;  %2565 = vmatmul.mubr.bf16.vlgmr.msra.gmra.mxu1 %v941_v39  ;;  %v4392_v25 = vsel %vm922_vm0, %v864_v52, %v2854_v43  ;;  %v4395_v38 = vsel %vm922_vm0, %v870_v63, %v2857_v48  ;;  %v4405_v6 = vsel %vm922_vm0, %v868_v45, %v2856_v46  ;;  %v3587_v51 = vld [vmem:[#allocation7 + $0x340] ss:$8 sps:$4 sm:$0xff]   ;;  %v3595_v52 = vld [vmem:[#allocation7 + $0x334] ss:$8 sps:$4 sm:$0xff]   ;;  %v3602_v29 = vld [vmem:[#allocation7 + $0x210] ss:$8 sps:$4 sm:$0xff]  }
 0x169   :  { %2605 = vmatprep.mubr.bf16.mxu0 %v944_v47  ;;  %2615 = vmatpush1.bf16.msra.mxu1 %v3569_v35  ;;  %v4398_v40 = vsel %vm922_vm0, %v874_v2, %v905_v30  ;;  %v4408_v36 = vsel %vm922_vm0, %v872_v49, %v2858_v56  ;;  %v3605_v34 = vld [vmem:[#allocation7 + $0x310] ss:$8 sps:$4 sm:$0xff]   ;;  %v3610_v43 = vld [vmem:[#allocation7 + $0x204] ss:$8 sps:$4 sm:$0xff]   ;;  %v3608_v55 = vld [vmem:[#allocation7 + $0x200] ss:$8 sps:$4 sm:$0xff]  }
 0x16a   :  { %2646 = vmatprep.mubr.bf16.mxu1 %v946_v61  ;;  %2575 = vmatprep.subr.bf16.mxu0 %v3574_v53  ;;  %v3613_v48 = vld [vmem:[#allocation7 + $0x304] ss:$8 sps:$4 sm:$0xff]   ;;  %v3611_v21 = vld [vmem:[#allocation7 + $0x300] ss:$8 sps:$4 sm:$0xff]   ;;  %v3619_v3 = vld [vmem:[#allocation7 + $0x3f4] ss:$8 sps:$4 sm:$0xff]  }
 0x16b   :  { %2616 = vmatprep.subr.bf16.mxu1 %v3577_v62  ;;  %v3617_v5 = vld [vmem:[#allocation7 + $0x3f0] ss:$8 sps:$4 sm:$0xff]   ;;  %v3622_v9 = vld [vmem:[#allocation7 + $0x2e4] ss:$8 sps:$4 sm:$0xff]   ;;  %v3620_v11 = vld [vmem:[#allocation7 + $0x2e0] ss:$8 sps:$4 sm:$0xff]  }
 0x16c   :  { %2576 = vmatpush1.bf16.msra.mxu0 %v3572_v7  ;;  %v3625_v10 = vld [vmem:[#allocation7 + $0x3e4] ss:$8 sps:$4 sm:$0xff]   ;;  %v3623_v16 = vld [vmem:[#allocation7 + $0x3e0] ss:$8 sps:$4 sm:$0xff]   ;;  %v3628_v23 = vld [vmem:[#allocation7 + $0x2d4] ss:$8 sps:$4 sm:$0xff]  }
 0x16d   :  { %2617 = vmatpush1.bf16.msra.mxu1 %v3575_v31  ;;  %2577 = vmatprep.subr.bf16.mxu0 %v3580_v32  ;;  %v3631_v24 = vld [vmem:[#allocation7 + $0x3d4] ss:$8 sps:$4 sm:$0xff]   ;;  %v3626_v26 = vld [vmem:[#allocation7 + $0x2d0] ss:$8 sps:$4 sm:$0xff]   ;;  %v3634_v28 = vld [vmem:[#allocation7 + $0x2c4] ss:$8 sps:$4 sm:$0xff]  }
 0x16e   :  { %2618 = vmatprep.subr.bf16.mxu1 %v3583_v37  ;;  %v3629_v27 = vld [vmem:[#allocation7 + $0x3d0] ss:$8 sps:$4 sm:$0xff]   ;;  %v3637_v35 = vld [vmem:[#allocation7 + $0x3c4] ss:$8 sps:$4 sm:$0xff]   ;;  %v3632_v39 = vld [vmem:[#allocation7 + $0x2c0] ss:$8 sps:$4 sm:$0xff]  }
 0x16f   :  { %v3635_v42 = vld [vmem:[#allocation7 + $0x3c0] ss:$8 sps:$4 sm:$0xff]   ;;  %v3640_v47 = vld [vmem:[#allocation7 + $0x2b4] ss:$8 sps:$4 sm:$0xff]   ;;  %v3638_v53 = vld [vmem:[#allocation7 + $0x2b0] ss:$8 sps:$4 sm:$0xff]  }
 0x170   :  { %2578 = vmatpush1.bf16.msra.mxu0 %v3578_v57  ;;  %v3643_v50 = vld [vmem:[#allocation7 + $0x3b4] ss:$8 sps:$4 sm:$0xff]   ;;  %v3641_v61 = vld [vmem:[#allocation7 + $0x3b0] ss:$8 sps:$4 sm:$0xff]   ;;  %v3646_v62 = vld [vmem:[#allocation7 + $0x2a4] ss:$8 sps:$4 sm:$0xff]  }
 0x171   :  { %2619 = vmatpush1.bf16.msra.mxu1 %v3581_v13  ;;  %2579 = vmatprep.subr.bf16.mxu0 %v3586_v33  ;;  %v3649_v63 = vld [vmem:[#allocation7 + $0x3a4] ss:$8 sps:$4 sm:$0xff]   ;;  %v3644_v2 = vld [vmem:[#allocation7 + $0x2a0] ss:$8 sps:$4 sm:$0xff]   ;;  %v3652_v30 = vld [vmem:[#allocation7 + $0x294] ss:$8 sps:$4 sm:$0xff]  }
 0x172   :  { %2620 = vmatprep.subr.bf16.mxu1 %v3589_v44  ;;  %v3647_v7 = vld [vmem:[#allocation7 + $0x3a0] ss:$8 sps:$4 sm:$0xff]   ;;  %v3655_v31 = vld [vmem:[#allocation7 + $0x394] ss:$8 sps:$4 sm:$0xff]   ;;  %v3650_v32 = vld [vmem:[#allocation7 + $0x290] ss:$8 sps:$4 sm:$0xff]   ;;  %v943_v44 = vpack.c.bf16 %v4377_v58, %v4377_v58 }
 0x173   :  { %v3653_v37 = vld [vmem:[#allocation7 + $0x390] ss:$8 sps:$4 sm:$0xff]   ;;  %v3658_v45 = vld [vmem:[#allocation7 + $0x284] ss:$8 sps:$4 sm:$0xff]   ;;  %v3656_v49 = vld [vmem:[#allocation7 + $0x280] ss:$8 sps:$4 sm:$0xff]  }
 0x174   :  { %2580 = vmatpush1.bf16.msra.mxu0 %v3584_v54  ;;  %v3661_v46 = vld [vmem:[#allocation7 + $0x384] ss:$8 sps:$4 sm:$0xff]   ;;  %v3659_v56 = vld [vmem:[#allocation7 + $0x380] ss:$8 sps:$4 sm:$0xff]   ;;  %v3664_v57 = vld [vmem:[#allocation7 + $0x474] ss:$8 sps:$4 sm:$0xff]  }
 0x175   :  { %2621 = vmatpush1.bf16.msra.mxu1 %v3587_v51  ;;  %2581 = vmatprep.subr.bf16.mxu0 %v3592_v41  ;;  %v3667_v13 = vld [vmem:[#allocation7 + $0x574] ss:$8 sps:$4 sm:$0xff]   ;;  %v3662_v33 = vld [vmem:[#allocation7 + $0x470] ss:$8 sps:$4 sm:$0xff]   ;;  %v945_v51 = vpack.c.bf16 %v4380_v59, %v4380_v59  ;;  %v3670_v41 = vld [vmem:[#allocation7 + $0x464] ss:$8 sps:$4 sm:$0xff]  }
 0x176   :  { %2622 = vmatprep.subr.bf16.mxu1 %v3595_v52  ;;  %v3665_v54 = vld [vmem:[#allocation7 + $0x570] ss:$8 sps:$4 sm:$0xff]   ;;  %v948_v52 = vpack.c.bf16 %v4364_v20, %v4364_v20  ;;  %v3671_v58 = vld [vmem:[#allocation7 + $0x560] ss:$8 sps:$4 sm:$0xff]   ;;  %v3679_v59 = vld [vmem:[#allocation7 + $0x554] ss:$8 sps:$4 sm:$0xff]  }
 0x177   :  { %v3677_v20 = vld [vmem:[#allocation7 + $0x550] ss:$8 sps:$4 sm:$0xff]  }
 0x178   :  { %2582 = vmatpush1.bf16.msra.mxu0 %v3590_v60  ;;  %v3673_v60 = vld [vmem:[#allocation7 + $0x564] ss:$8 sps:$4 sm:$0xff]  }
 0x179   :  { %2623 = vmatpush1.bf16.msra.mxu1 %v3593_v0  ;;  %2583 = vmatprep.subr.bf16.mxu0 %v3598_v1  ;;  %v950_v0 = vpack.c.bf16 %v4385_v12, %v4385_v12  ;;  %v3668_v1 = vld [vmem:[#allocation7 + $0x460] ss:$8 sps:$4 sm:$0xff]  }
 0x17a   :  { %2624 = vmatprep.subr.bf16.mxu1 %v3601_v8  ;;  %v3676_v8 = vld [vmem:[#allocation7 + $0x454] ss:$8 sps:$4 sm:$0xff]   ;;  %v3683_v12 = vld [vmem:[#allocation7 + $0x540] ss:$8 sps:$4 sm:$0xff]  }
 0x17c   :  { %2584 = vmatpush1.bf16.msra.mxu0 %v3596_v14  ;;  %v3674_v14 = vld [vmem:[#allocation7 + $0x450] ss:$8 sps:$4 sm:$0xff]  }
 0x17d   :  { %2625 = vmatpush1.bf16.msra.mxu1 %v3599_v15  ;;  %2585 = vmatprep.subr.bf16.mxu0 %v3604_v17  ;;  %v3682_v15 = vld [vmem:[#allocation7 + $0x444] ss:$8 sps:$4 sm:$0xff]  }
 0x17e   :  { %2626 = vmatprep.subr.bf16.mxu1 %v3607_v19  ;;  %v3685_v17 = vld [vmem:[#allocation7 + $0x544] ss:$8 sps:$4 sm:$0xff]   ;;  %v3680_v19 = vld [vmem:[#allocation7 + $0x440] ss:$8 sps:$4 sm:$0xff]  }
 0x180   :  { %2586 = vmatpush1.bf16.msra.mxu0 %v3602_v29  ;;  %v3688_v29 = vld [vmem:[#allocation7 + $0x434] ss:$8 sps:$4 sm:$0xff]  }
 0x181   :  { %2627 = vmatpush1.bf16.msra.mxu1 %v3605_v34  ;;  %2587 = vmatprep.subr.bf16.mxu0 %v3610_v43  ;;  %v3691_v34 = vld [vmem:[#allocation7 + $0x534] ss:$8 sps:$4 sm:$0xff]   ;;  %v3686_v43 = vld [vmem:[#allocation7 + $0x430] ss:$8 sps:$4 sm:$0xff]  }
 0x182   :  { %2628 = vmatprep.subr.bf16.mxu1 %v3613_v48  ;;  %v3689_v48 = vld [vmem:[#allocation7 + $0x530] ss:$8 sps:$4 sm:$0xff]  }
 0x184   :  { %2588 = vmatpush1.bf16.msra.mxu0 %v3608_v55  ;;  %v3694_v55 = vld [vmem:[#allocation7 + $0x424] ss:$8 sps:$4 sm:$0xff]  }
 0x185   :  { %2629 = vmatpush1.bf16.msra.mxu1 %v3611_v21  ;;  %2589 = vmatprep.subr.bf16.mxu0 %v3616_v22  ;;  %v3697_v21 = vld [vmem:[#allocation7 + $0x524] ss:$8 sps:$4 sm:$0xff]   ;;  %v3692_v22 = vld [vmem:[#allocation7 + $0x420] ss:$8 sps:$4 sm:$0xff]  }
 0x186   :  { %2630 = vmatprep.subr.bf16.mxu1 %v3619_v3  ;;  %v3695_v3 = vld [vmem:[#allocation7 + $0x520] ss:$8 sps:$4 sm:$0xff]  }
 0x188   :  { %2590 = vmatpush2.bf16.msra.mxu0 %v3614_v4  ;;  %v3700_v4 = vld [vmem:[#allocation7 + $0x414] ss:$8 sps:$4 sm:$0xff]  }
 0x189   :  { %2631 = vmatpush2.bf16.msra.mxu1 %v3617_v5  ;;  %2591 = vmatprep.subr.bf16.mxu0 %v3622_v9  ;;  %v3703_v5 = vld [vmem:[#allocation7 + $0x514] ss:$8 sps:$4 sm:$0xff]   ;;  %v3698_v9 = vld [vmem:[#allocation7 + $0x410] ss:$8 sps:$4 sm:$0xff]  }
 0x18a   :  { %2632 = vmatprep.subr.bf16.mxu1 %v3625_v10  ;;  %v3701_v10 = vld [vmem:[#allocation7 + $0x510] ss:$8 sps:$4 sm:$0xff]  }
 0x18c   :  { %2592 = vmatpush2.bf16.msra.mxu0 %v3620_v11  ;;  %v3706_v11 = vld [vmem:[#allocation7 + $0x404] ss:$8 sps:$4 sm:$0xff]  }
 0x18d   :  { %2633 = vmatpush2.bf16.msra.mxu1 %v3623_v16  ;;  %2593 = vmatprep.subr.bf16.mxu0 %v3628_v23  ;;  %v3709_v16 = vld [vmem:[#allocation7 + $0x504] ss:$8 sps:$4 sm:$0xff]   ;;  %v3704_v23 = vld [vmem:[#allocation7 + $0x400] ss:$8 sps:$4 sm:$0xff]  }
 0x18e   :  { %2634 = vmatprep.subr.bf16.mxu1 %v3631_v24  ;;  %v3707_v24 = vld [vmem:[#allocation7 + $0x500] ss:$8 sps:$4 sm:$0xff]  }
 0x190   :  { %2594 = vmatpush2.bf16.msra.mxu0 %v3626_v26  ;;  %v3712_v26 = vld [vmem:[#allocation7 + $0x4f4] ss:$8 sps:$4 sm:$0xff]  }
 0x191   :  { %2635 = vmatpush2.bf16.msra.mxu1 %v3629_v27  ;;  %2595 = vmatprep.subr.bf16.mxu0 %v3634_v28  ;;  %v3715_v27 = vld [vmem:[#allocation7 + $0x5f4] ss:$8 sps:$4 sm:$0xff]   ;;  %v3710_v28 = vld [vmem:[#allocation7 + $0x4f0] ss:$8 sps:$4 sm:$0xff]  }
 0x192   :  { %2636 = vmatprep.subr.bf16.mxu1 %v3637_v35  ;;  %v3713_v35 = vld [vmem:[#allocation7 + $0x5f0] ss:$8 sps:$4 sm:$0xff]  }
 0x194   :  { %2596 = vmatpush2.bf16.msra.mxu0 %v3632_v39  ;;  %v3718_v39 = vld [vmem:[#allocation7 + $0x4e4] ss:$8 sps:$4 sm:$0xff]  }
 0x195   :  { %2637 = vmatpush2.bf16.msra.mxu1 %v3635_v42  ;;  %2597 = vmatprep.subr.bf16.mxu0 %v3640_v47  ;;  %v3721_v42 = vld [vmem:[#allocation7 + $0x5e4] ss:$8 sps:$4 sm:$0xff]   ;;  %v3716_v47 = vld [vmem:[#allocation7 + $0x4e0] ss:$8 sps:$4 sm:$0xff]  }
 0x196   :  { %2638 = vmatprep.subr.bf16.mxu1 %v3643_v50  ;;  %v3719_v50 = vld [vmem:[#allocation7 + $0x5e0] ss:$8 sps:$4 sm:$0xff]  }
 0x198   :  { %2598 = vmatpush2.bf16.msra.mxu0 %v3638_v53  ;;  %v3724_v53 = vld [vmem:[#allocation7 + $0x4d4] ss:$8 sps:$4 sm:$0xff]  }
 0x199   :  { %2639 = vmatpush2.bf16.msra.mxu1 %v3641_v61  ;;  %2599 = vmatprep.subr.bf16.mxu0 %v3646_v62  ;;  %v3727_v61 = vld [vmem:[#allocation7 + $0x5d4] ss:$8 sps:$4 sm:$0xff]   ;;  %v3722_v62 = vld [vmem:[#allocation7 + $0x4d0] ss:$8 sps:$4 sm:$0xff]  }
 0x19a   :  { %2640 = vmatprep.subr.bf16.mxu1 %v3649_v63  ;;  %v3725_v63 = vld [vmem:[#allocation7 + $0x5d0] ss:$8 sps:$4 sm:$0xff]  }
 0x19c   :  { %2600 = vmatpush2.bf16.msra.mxu0 %v3644_v2  ;;  %v3730_v2 = vld [vmem:[#allocation7 + $0x4c4] ss:$8 sps:$4 sm:$0xff]  }
 0x19d   :  { %2641 = vmatpush2.bf16.msra.mxu1 %v3647_v7  ;;  %2601 = vmatprep.subr.bf16.mxu0 %v3652_v30  ;;  %v3733_v7 = vld [vmem:[#allocation7 + $0x5c4] ss:$8 sps:$4 sm:$0xff]   ;;  %v3728_v30 = vld [vmem:[#allocation7 + $0x4c0] ss:$8 sps:$4 sm:$0xff]  }
 0x19e   :  { %2642 = vmatprep.subr.bf16.mxu1 %v3655_v31  ;;  %v3731_v31 = vld [vmem:[#allocation7 + $0x5c0] ss:$8 sps:$4 sm:$0xff]  }
 0x1a0   :  { %2602 = vmatpush2.bf16.msra.mxu0 %v3650_v32  ;;  %v3736_v32 = vld [vmem:[#allocation7 + $0x4b4] ss:$8 sps:$4 sm:$0xff]  }
 0x1a1   :  { %2643 = vmatpush2.bf16.msra.mxu1 %v3653_v37  ;;  %2603 = vmatprep.subr.bf16.mxu0 %v3658_v45  ;;  %v3739_v37 = vld [vmem:[#allocation7 + $0x5b4] ss:$8 sps:$4 sm:$0xff]   ;;  %v3734_v45 = vld [vmem:[#allocation7 + $0x4b0] ss:$8 sps:$4 sm:$0xff]  }
 0x1a2   :  { %2644 = vmatprep.subr.bf16.mxu1 %v3661_v46  ;;  %v3737_v46 = vld [vmem:[#allocation7 + $0x5b0] ss:$8 sps:$4 sm:$0xff]  }
 0x1a4   :  { %2604 = vmatpush2.bf16.msra.mxu0 %v3656_v49  ;;  %v3742_v49 = vld [vmem:[#allocation7 + $0x4a4] ss:$8 sps:$4 sm:$0xff]  }
 0x1a5   :  { %2645 = vmatpush2.bf16.msra.mxu1 %v3659_v56  ;;  %2655 = vmatprep.subr.bf16.mxu0 %v3664_v57  ;;  %v3745_v56 = vld [vmem:[#allocation7 + $0x5a4] ss:$8 sps:$4 sm:$0xff]   ;;  %v3740_v57 = vld [vmem:[#allocation7 + $0x4a0] ss:$8 sps:$4 sm:$0xff]  }
 0x1a6   :  { %2696 = vmatprep.subr.bf16.mxu1 %v3667_v13  ;;  %v3743_v13 = vld [vmem:[#allocation7 + $0x5a0] ss:$8 sps:$4 sm:$0xff]  }
 0x1a7   :  { %2606 = vmatmul.mubr.bf16.vlgmr.msra.gmra.mxu0 %v943_v44  ;;  %v3751_v44 = vld [vmem:[#allocation7 + $0x594] ss:$8 sps:$4 sm:$0xff]  }
 0x1a8   :  { %2647 = vmatmul.mubr.bf16.vlgmr.msra.gmra.mxu1 %v945_v51  ;;  %2656 = vmatpush1.bf16.msra.mxu0 %v3662_v33  ;;  %v3748_v33 = vld [vmem:[#allocation7 + $0x494] ss:$8 sps:$4 sm:$0xff]   ;;  %v3749_v51 = vld [vmem:[#allocation7 + $0x590] ss:$8 sps:$4 sm:$0xff]  }
 0x1a9   :  { %2687 = vmatprep.mubr.bf16.mxu0 %v948_v52  ;;  %2697 = vmatpush1.bf16.msra.mxu1 %v3665_v54  ;;  %v3746_v54 = vld [vmem:[#allocation7 + $0x490] ss:$8 sps:$4 sm:$0xff]   ;;  %v3757_v52 = vld [vmem:[#allocation7 + $0x584] ss:$8 sps:$4 sm:$0xff]  }
 0x1aa   :  { %2728 = vmatprep.mubr.bf16.mxu1 %v950_v0  ;;  %2657 = vmatprep.subr.bf16.mxu0 %v3670_v41  ;;  %v3754_v41 = vld [vmem:[#allocation7 + $0x484] ss:$8 sps:$4 sm:$0xff]   ;;  %v3755_v0 = vld [vmem:[#allocation7 + $0x580] ss:$8 sps:$4 sm:$0xff]  }
 0x1ab   :  { %2698 = vmatprep.subr.bf16.mxu1 %v3673_v60  ;;  %v3752_v60 = vld [vmem:[#allocation7 + $0x480] ss:$8 sps:$4 sm:$0xff]  }
 0x1ac   :  { %2658 = vmatpush1.bf16.msra.mxu0 %v3668_v1  ;;  %v3760_v1 = vld [vmem:[#allocation7 + $0x674] ss:$8 sps:$4 sm:$0xff]  }
 0x1ad   :  { %2699 = vmatpush1.bf16.msra.mxu1 %v3671_v58  ;;  %2659 = vmatprep.subr.bf16.mxu0 %v3676_v8  ;;  %v3763_v58 = vld [vmem:[#allocation7 + $0x774] ss:$8 sps:$4 sm:$0xff]   ;;  %v3758_v8 = vld [vmem:[#allocation7 + $0x670] ss:$8 sps:$4 sm:$0xff]  }
 0x1ae   :  { %2700 = vmatprep.subr.bf16.mxu1 %v3679_v59  ;;  %v947_v59 = vpack.c.bf16 %v4389_v18, %v4389_v18  ;;  %v3767_v18 = vld [vmem:[#allocation7 + $0x760] ss:$8 sps:$4 sm:$0xff]  }
 0x1b0   :  { %2660 = vmatpush1.bf16.msra.mxu0 %v3674_v14  ;;  %v3761_v14 = vld [vmem:[#allocation7 + $0x770] ss:$8 sps:$4 sm:$0xff]  }
 0x1b1   :  { %2701 = vmatpush1.bf16.msra.mxu1 %v3677_v20  ;;  %2661 = vmatprep.subr.bf16.mxu0 %v3682_v15  ;;  %v949_v20 = vpack.c.bf16 %v4392_v25, %v4392_v25  ;;  %v3766_v15 = vld [vmem:[#allocation7 + $0x664] ss:$8 sps:$4 sm:$0xff]   ;;  %v3775_v25 = vld [vmem:[#allocation7 + $0x754] ss:$8 sps:$4 sm:$0xff]  }
 0x1b2   :  { %2702 = vmatprep.subr.bf16.mxu1 %v3685_v17  ;;  %v952_v17 = vpack.c.bf16 %v4395_v38, %v4395_v38  ;;  %v3773_v38 = vld [vmem:[#allocation7 + $0x750] ss:$8 sps:$4 sm:$0xff]  }
 0x1b4   :  { %2662 = vmatpush1.bf16.msra.mxu0 %v3680_v19  ;;  %v3769_v19 = vld [vmem:[#allocation7 + $0x764] ss:$8 sps:$4 sm:$0xff]  }
 0x1b5   :  { %2703 = vmatpush1.bf16.msra.mxu1 %v3683_v12  ;;  %2663 = vmatprep.subr.bf16.mxu0 %v3688_v29  ;;  %v954_v12 = vpack.c.bf16 %v4398_v40, %v4398_v40  ;;  %v3764_v29 = vld [vmem:[#allocation7 + $0x660] ss:$8 sps:$4 sm:$0xff]  }
 0x1b6   :  { %2704 = vmatprep.subr.bf16.mxu1 %v3691_v34  ;;  %v3772_v34 = vld [vmem:[#allocation7 + $0x654] ss:$8 sps:$4 sm:$0xff]   ;;  %v3779_v40 = vld [vmem:[#allocation7 + $0x740] ss:$8 sps:$4 sm:$0xff]  }
 0x1b8   :  { %2664 = vmatpush1.bf16.msra.mxu0 %v3686_v43  ;;  %v3770_v43 = vld [vmem:[#allocation7 + $0x650] ss:$8 sps:$4 sm:$0xff]  }
 0x1b9   :  { %2705 = vmatpush1.bf16.msra.mxu1 %v3689_v48  ;;  %2665 = vmatprep.subr.bf16.mxu0 %v3694_v55  ;;  %v3778_v48 = vld [vmem:[#allocation7 + $0x644] ss:$8 sps:$4 sm:$0xff]  }
 0x1ba   :  { %2706 = vmatprep.subr.bf16.mxu1 %v3697_v21  ;;  %v3781_v55 = vld [vmem:[#allocation7 + $0x744] ss:$8 sps:$4 sm:$0xff]   ;;  %v3776_v21 = vld [vmem:[#allocation7 + $0x640] ss:$8 sps:$4 sm:$0xff]  }
 0x1bc   :  { %2666 = vmatpush1.bf16.msra.mxu0 %v3692_v22  ;;  %v3784_v22 = vld [vmem:[#allocation7 + $0x634] ss:$8 sps:$4 sm:$0xff]  }
 0x1bd   :  { %2707 = vmatpush1.bf16.msra.mxu1 %v3695_v3  ;;  %2667 = vmatprep.subr.bf16.mxu0 %v3700_v4  ;;  %v3787_v3 = vld [vmem:[#allocation7 + $0x734] ss:$8 sps:$4 sm:$0xff]   ;;  %v3782_v4 = vld [vmem:[#allocation7 + $0x630] ss:$8 sps:$4 sm:$0xff]  }
 0x1be   :  { %2708 = vmatprep.subr.bf16.mxu1 %v3703_v5  ;;  %v3785_v5 = vld [vmem:[#allocation7 + $0x730] ss:$8 sps:$4 sm:$0xff]  }
 0x1c0   :  { %2668 = vmatpush1.bf16.msra.mxu0 %v3698_v9  ;;  %v3790_v9 = vld [vmem:[#allocation7 + $0x624] ss:$8 sps:$4 sm:$0xff]  }
 0x1c1   :  { %2709 = vmatpush1.bf16.msra.mxu1 %v3701_v10  ;;  %2669 = vmatprep.subr.bf16.mxu0 %v3706_v11  ;;  %v3793_v10 = vld [vmem:[#allocation7 + $0x724] ss:$8 sps:$4 sm:$0xff]   ;;  %v3788_v11 = vld [vmem:[#allocation7 + $0x620] ss:$8 sps:$4 sm:$0xff]  }
 0x1c2   :  { %2710 = vmatprep.subr.bf16.mxu1 %v3709_v16  ;;  %v3791_v16 = vld [vmem:[#allocation7 + $0x720] ss:$8 sps:$4 sm:$0xff]  }
 0x1c4   :  { %2670 = vmatpush1.bf16.msra.mxu0 %v3704_v23  ;;  %v3796_v23 = vld [vmem:[#allocation7 + $0x614] ss:$8 sps:$4 sm:$0xff]  }
 0x1c5   :  { %2711 = vmatpush1.bf16.msra.mxu1 %v3707_v24  ;;  %2671 = vmatprep.subr.bf16.mxu0 %v3712_v26  ;;  %v3799_v24 = vld [vmem:[#allocation7 + $0x714] ss:$8 sps:$4 sm:$0xff]   ;;  %v3794_v26 = vld [vmem:[#allocation7 + $0x610] ss:$8 sps:$4 sm:$0xff]  }
 0x1c6   :  { %2712 = vmatprep.subr.bf16.mxu1 %v3715_v27  ;;  %v3797_v27 = vld [vmem:[#allocation7 + $0x710] ss:$8 sps:$4 sm:$0xff]  }
 0x1c8   :  { %2672 = vmatpush2.bf16.msra.mxu0 %v3710_v28  ;;  %v3802_v28 = vld [vmem:[#allocation7 + $0x604] ss:$8 sps:$4 sm:$0xff]  }
 0x1c9   :  { %2713 = vmatpush2.bf16.msra.mxu1 %v3713_v35  ;;  %2673 = vmatprep.subr.bf16.mxu0 %v3718_v39  ;;  %v3805_v35 = vld [vmem:[#allocation7 + $0x704] ss:$8 sps:$4 sm:$0xff]   ;;  %v3800_v39 = vld [vmem:[#allocation7 + $0x600] ss:$8 sps:$4 sm:$0xff]  }
 0x1ca   :  { %2714 = vmatprep.subr.bf16.mxu1 %v3721_v42  ;;  %v3803_v42 = vld [vmem:[#allocation7 + $0x700] ss:$8 sps:$4 sm:$0xff]  }
 0x1cc   :  { %2674 = vmatpush2.bf16.msra.mxu0 %v3716_v47  ;;  %v3808_v47 = vld [vmem:[#allocation7 + $0x6f4] ss:$8 sps:$4 sm:$0xff]  }
 0x1cd   :  { %2715 = vmatpush2.bf16.msra.mxu1 %v3719_v50  ;;  %2675 = vmatprep.subr.bf16.mxu0 %v3724_v53  ;;  %v3811_v50 = vld [vmem:[#allocation7 + $0x7f4] ss:$8 sps:$4 sm:$0xff]   ;;  %v3806_v53 = vld [vmem:[#allocation7 + $0x6f0] ss:$8 sps:$4 sm:$0xff]  }
 0x1ce   :  { %2716 = vmatprep.subr.bf16.mxu1 %v3727_v61  ;;  %v3809_v61 = vld [vmem:[#allocation7 + $0x7f0] ss:$8 sps:$4 sm:$0xff]  }
 0x1d0   :  { %2676 = vmatpush2.bf16.msra.mxu0 %v3722_v62  ;;  %v3814_v62 = vld [vmem:[#allocation7 + $0x6e4] ss:$8 sps:$4 sm:$0xff]  }
 0x1d1   :  { %2717 = vmatpush2.bf16.msra.mxu1 %v3725_v63  ;;  %2677 = vmatprep.subr.bf16.mxu0 %v3730_v2  ;;  %v3817_v63 = vld [vmem:[#allocation7 + $0x7e4] ss:$8 sps:$4 sm:$0xff]   ;;  %v3812_v2 = vld [vmem:[#allocation7 + $0x6e0] ss:$8 sps:$4 sm:$0xff]  }
 0x1d2   :  { %2718 = vmatprep.subr.bf16.mxu1 %v3733_v7  ;;  %v3815_v7 = vld [vmem:[#allocation7 + $0x7e0] ss:$8 sps:$4 sm:$0xff]  }
 0x1d4   :  { %2678 = vmatpush2.bf16.msra.mxu0 %v3728_v30  ;;  %v3820_v30 = vld [vmem:[#allocation7 + $0x6d4] ss:$8 sps:$4 sm:$0xff]  }
 0x1d5   :  { %2719 = vmatpush2.bf16.msra.mxu1 %v3731_v31  ;;  %2679 = vmatprep.subr.bf16.mxu0 %v3736_v32  ;;  %v3823_v31 = vld [vmem:[#allocation7 + $0x7d4] ss:$8 sps:$4 sm:$0xff]   ;;  %v3818_v32 = vld [vmem:[#allocation7 + $0x6d0] ss:$8 sps:$4 sm:$0xff]  }
 0x1d6   :  { %2720 = vmatprep.subr.bf16.mxu1 %v3739_v37  ;;  %v3821_v37 = vld [vmem:[#allocation7 + $0x7d0] ss:$8 sps:$4 sm:$0xff]  }
 0x1d8   :  { %2680 = vmatpush2.bf16.msra.mxu0 %v3734_v45  ;;  %v3826_v45 = vld [vmem:[#allocation7 + $0x6c4] ss:$8 sps:$4 sm:$0xff]  }
 0x1d9   :  { %2721 = vmatpush2.bf16.msra.mxu1 %v3737_v46  ;;  %2681 = vmatprep.subr.bf16.mxu0 %v3742_v49  ;;  %v3829_v46 = vld [vmem:[#allocation7 + $0x7c4] ss:$8 sps:$4 sm:$0xff]   ;;  %v3824_v49 = vld [vmem:[#allocation7 + $0x6c0] ss:$8 sps:$4 sm:$0xff]  }
 0x1da   :  { %2722 = vmatprep.subr.bf16.mxu1 %v3745_v56  ;;  %v3827_v56 = vld [vmem:[#allocation7 + $0x7c0] ss:$8 sps:$4 sm:$0xff]  }
 0x1dc   :  { %2682 = vmatpush2.bf16.msra.mxu0 %v3740_v57  ;;  %v3832_v57 = vld [vmem:[#allocation7 + $0x6b4] ss:$8 sps:$4 sm:$0xff]  }
 0x1dd   :  { %2723 = vmatpush2.bf16.msra.mxu1 %v3743_v13  ;;  %2683 = vmatprep.subr.bf16.mxu0 %v3748_v33  ;;  %v3835_v13 = vld [vmem:[#allocation7 + $0x7b4] ss:$8 sps:$4 sm:$0xff]   ;;  %v3830_v33 = vld [vmem:[#allocation7 + $0x6b0] ss:$8 sps:$4 sm:$0xff]  }
 0x1de   :  { %2724 = vmatprep.subr.bf16.mxu1 %v3751_v44  ;;  %v3833_v44 = vld [vmem:[#allocation7 + $0x7b0] ss:$8 sps:$4 sm:$0xff]  }
 0x1e0   :  { %2684 = vmatpush2.bf16.msra.mxu0 %v3746_v54  ;;  %v3838_v54 = vld [vmem:[#allocation7 + $0x6a4] ss:$8 sps:$4 sm:$0xff]  }
 0x1e1   :  { %2725 = vmatpush2.bf16.msra.mxu1 %v3749_v51  ;;  %2685 = vmatprep.subr.bf16.mxu0 %v3754_v41  ;;  %v3841_v51 = vld [vmem:[#allocation7 + $0x7a4] ss:$8 sps:$4 sm:$0xff]   ;;  %v3836_v41 = vld [vmem:[#allocation7 + $0x6a0] ss:$8 sps:$4 sm:$0xff]  }
 0x1e2   :  { %2726 = vmatprep.subr.bf16.mxu1 %v3757_v52  ;;  %v3839_v52 = vld [vmem:[#allocation7 + $0x7a0] ss:$8 sps:$4 sm:$0xff]  }
 0x1e4   :  { %2686 = vmatpush2.bf16.msra.mxu0 %v3752_v60  ;;  %v3844_v60 = vld [vmem:[#allocation7 + $0x694] ss:$8 sps:$4 sm:$0xff]  }
 0x1e5   :  { %2727 = vmatpush2.bf16.msra.mxu1 %v3755_v0  ;;  %2737 = vmatprep.subr.bf16.mxu0 %v3760_v1  ;;  %v3847_v0 = vld [vmem:[#allocation7 + $0x794] ss:$8 sps:$4 sm:$0xff]   ;;  %v3842_v1 = vld [vmem:[#allocation7 + $0x690] ss:$8 sps:$4 sm:$0xff]  }
 0x1e6   :  { %2778 = vmatprep.subr.bf16.mxu1 %v3763_v58  ;;  %v3845_v58 = vld [vmem:[#allocation7 + $0x790] ss:$8 sps:$4 sm:$0xff]  }
 0x1e7   :  { %2688 = vmatmul.mubr.bf16.vlgmr.msra.gmra.mxu0 %v947_v59  ;;  %v3853_v59 = vld [vmem:[#allocation7 + $0x784] ss:$8 sps:$4 sm:$0xff]  }
 0x1e8   :  { %2729 = vmatmul.mubr.bf16.vlgmr.msra.gmra.mxu1 %v949_v20  ;;  %2738 = vmatpush1.bf16.msra.mxu0 %v3758_v8  ;;  %v3850_v8 = vld [vmem:[#allocation7 + $0x684] ss:$8 sps:$4 sm:$0xff]   ;;  %v3851_v20 = vld [vmem:[#allocation7 + $0x780] ss:$8 sps:$4 sm:$0xff]  }
 0x1e9   :  { %2769 = vmatprep.mubr.bf16.mxu0 %v952_v17  ;;  %2779 = vmatpush1.bf16.msra.mxu1 %v3761_v14  ;;  %v3848_v14 = vld [vmem:[#allocation7 + $0x680] ss:$8 sps:$4 sm:$0xff]   ;;  %v953_v17 = vpack.c.bf16 %v4408_v36, %v4408_v36 }
 0x1ea   :  { %2810 = vmatprep.mubr.bf16.mxu1 %v954_v12  ;;  %2739 = vmatprep.subr.bf16.mxu0 %v3766_v15  ;;  %v951_v15 = vpack.c.bf16 %v4405_v6, %v4405_v6 }
 0x1eb   :  { %2780 = vmatprep.subr.bf16.mxu1 %v3769_v19 }
 0x1ec   :  { %2740 = vmatpush1.bf16.msra.mxu0 %v3764_v29 }
 0x1ed   :  { %2781 = vmatpush1.bf16.msra.mxu1 %v3767_v18  ;;  %2741 = vmatprep.subr.bf16.mxu0 %v3772_v34 }
 0x1ee   :  { %2782 = vmatprep.subr.bf16.mxu1 %v3775_v25 }
 0x1f0   :  { %2742 = vmatpush1.bf16.msra.mxu0 %v3770_v43 }
 0x1f1   :  { %2783 = vmatpush1.bf16.msra.mxu1 %v3773_v38  ;;  %2743 = vmatprep.subr.bf16.mxu0 %v3778_v48 }
 0x1f2   :  { %2784 = vmatprep.subr.bf16.mxu1 %v3781_v55 }
 0x1f4   :  { %2744 = vmatpush1.bf16.msra.mxu0 %v3776_v21 }
 0x1f5   :  { %2785 = vmatpush1.bf16.msra.mxu1 %v3779_v40  ;;  %2745 = vmatprep.subr.bf16.mxu0 %v3784_v22 }
 0x1f6   :  { %2786 = vmatprep.subr.bf16.mxu1 %v3787_v3 }
 0x1f8   :  { %2746 = vmatpush1.bf16.msra.mxu0 %v3782_v4 }
 0x1f9   :  { %2787 = vmatpush1.bf16.msra.mxu1 %v3785_v5  ;;  %2747 = vmatprep.subr.bf16.mxu0 %v3790_v9 }
 0x1fa   :  { %2788 = vmatprep.subr.bf16.mxu1 %v3793_v10 }
 0x1fc   :  { %2748 = vmatpush1.bf16.msra.mxu0 %v3788_v11 }
 0x1fd   :  { %2789 = vmatpush1.bf16.msra.mxu1 %v3791_v16  ;;  %2749 = vmatprep.subr.bf16.mxu0 %v3796_v23 }
 0x1fe   :  { %2790 = vmatprep.subr.bf16.mxu1 %v3799_v24 }
 0x200   :  { %2750 = vmatpush1.bf16.msra.mxu0 %v3794_v26 }
 0x201   :  { %2791 = vmatpush1.bf16.msra.mxu1 %v3797_v27  ;;  %2751 = vmatprep.subr.bf16.mxu0 %v3802_v28 }
 0x202   :  { %2792 = vmatprep.subr.bf16.mxu1 %v3805_v35 }
 0x204   :  { %2752 = vmatpush1.bf16.msra.mxu0 %v3800_v39 }
 0x205   :  { %2793 = vmatpush1.bf16.msra.mxu1 %v3803_v42  ;;  %2753 = vmatprep.subr.bf16.mxu0 %v3808_v47 }
 0x206   :  { %2794 = vmatprep.subr.bf16.mxu1 %v3811_v50 }
 0x208   :  { %2754 = vmatpush2.bf16.msra.mxu0 %v3806_v53 }
 0x209   :  { %2795 = vmatpush2.bf16.msra.mxu1 %v3809_v61  ;;  %2755 = vmatprep.subr.bf16.mxu0 %v3814_v62 }
 0x20a   :  { %2796 = vmatprep.subr.bf16.mxu1 %v3817_v63 }
 0x20c   :  { %2756 = vmatpush2.bf16.msra.mxu0 %v3812_v2 }
 0x20d   :  { %2797 = vmatpush2.bf16.msra.mxu1 %v3815_v7  ;;  %2757 = vmatprep.subr.bf16.mxu0 %v3820_v30 }
 0x20e   :  { %2798 = vmatprep.subr.bf16.mxu1 %v3823_v31 }
 0x210   :  { %2758 = vmatpush2.bf16.msra.mxu0 %v3818_v32 }
 0x211   :  { %2799 = vmatpush2.bf16.msra.mxu1 %v3821_v37  ;;  %2759 = vmatprep.subr.bf16.mxu0 %v3826_v45 }
 0x212   :  { %2800 = vmatprep.subr.bf16.mxu1 %v3829_v46 }
 0x214   :  { %2760 = vmatpush2.bf16.msra.mxu0 %v3824_v49 }
 0x215   :  { %2801 = vmatpush2.bf16.msra.mxu1 %v3827_v56  ;;  %2761 = vmatprep.subr.bf16.mxu0 %v3832_v57 }
 0x216   :  { %2802 = vmatprep.subr.bf16.mxu1 %v3835_v13 }
 0x218   :  { %2762 = vmatpush2.bf16.msra.mxu0 %v3830_v33 }
 0x219   :  { %2803 = vmatpush2.bf16.msra.mxu1 %v3833_v44  ;;  %2763 = vmatprep.subr.bf16.mxu0 %v3838_v54 }
 0x21a   :  { %2804 = vmatprep.subr.bf16.mxu1 %v3841_v51 }
 0x21c   :  { %2764 = vmatpush2.bf16.msra.mxu0 %v3836_v41 }
 0x21d   :  { %2805 = vmatpush2.bf16.msra.mxu1 %v3839_v52  ;;  %2765 = vmatprep.subr.bf16.mxu0 %v3844_v60 }
 0x21e   :  { %2806 = vmatprep.subr.bf16.mxu1 %v3847_v0 }
 0x220   :  { %2766 = vmatpush2.bf16.msra.mxu0 %v3842_v1 }
 0x221   :  { %2807 = vmatpush2.bf16.msra.mxu1 %v3845_v58  ;;  %2767 = vmatprep.subr.bf16.mxu0 %v3850_v8 }
 0x222   :  { %2808 = vmatprep.subr.bf16.mxu1 %v3853_v59 }
 0x224   :  { %2768 = vmatpush2.bf16.msra.mxu0 %v3848_v14 }
 0x225   :  { %2809 = vmatpush2.bf16.msra.mxu1 %v3851_v20 }
 0x227   :  { %2770 = vmatmul.mubr.bf16.vlgmr.msra.gmra.mxu0 %v951_v15  ;;  %v2525_v19 = vpop.f32.mrf.mxu0 }
 0x228   :  { %2811 = vmatmul.mubr.bf16.vlgmr.msra.gmra.mxu1 %v953_v17  ;;  %v2566_v12 = vpop.f32.mrf.mxu1 }
 0x229   :  { %v2567_v29 = vadd.f32 %v2566_v12, %v2525_v19  ;;  %v2527_v18 = vpop.f32.mrf.mxu0 }
 0x22a   :  { %v2568_v34 = vpop.f32.mrf.mxu1 }
 0x22b   :  { %v2569_v25 = vadd.f32 %v2568_v34, %v2527_v18  ;;  %v2529_v43 = vpop.f32.mrf.mxu0 }
 0x22c   :  { %v2570_v38 = vpop.f32.mrf.mxu1 }
 0x22d   :  { %v2530_v48 = vpop.f32.mrf.mxu0 }
 0x22e   :  { %v2571_v55 = vpop.f32.mrf.mxu1 }
 0x267   :  { %v2607_v21 = vpop.f32.mrf.mxu0 }
 0x268   :  { %v2608_v40 = vadd.f32 %v2607_v21, %v2567_v29  ;;  %v2648_v22 = vpop.f32.mrf.mxu1 }
 0x269   :  { %v2609_v3 = vpop.f32.mrf.mxu0 }
 0x26a   :  { %v2649_v6 = vadd.f32 %v2648_v22, %v2608_v40  ;;  %v2610_v4 = vadd.f32 %v2609_v3, %v2569_v25  ;;  %v2650_v5 = vpop.f32.mrf.mxu1 }
 0x26b   :  { %v2611_v36 = vpop.f32.mrf.mxu0 }
 0x26c   :  { %v2651_v9 = vadd.f32 %v2650_v5, %v2610_v4  ;;  %v2652_v10 = vpop.f32.mrf.mxu1 }
 0x26d   :  { %v2612_v11 = vpop.f32.mrf.mxu0 }
 0x26e   :  { %v2653_v16 = vpop.f32.mrf.mxu1 }
 0x2a7   :  { %v2689_v23 = vpop.f32.mrf.mxu0 }
 0x2a8   :  { %v2730_v24 = vpop.f32.mrf.mxu1  ;;  %v2690_v47 = vadd.f32 %v2689_v23, %v2649_v6 }
 0x2a9   :  { %v2691_v26 = vpop.f32.mrf.mxu0 }
 0x2aa   :  { %v2732_v27 = vpop.f32.mrf.mxu1  ;;  %v2692_v50 = vadd.f32 %v2691_v26, %v2651_v9  ;;  %v2731_v53 = vadd.f32 %v2730_v24, %v2690_v47 }
 0x2ab   :  { %v2693_v28 = vpop.f32.mrf.mxu0 }
 0x2ac   :  { %v2734_v35 = vpop.f32.mrf.mxu1  ;;  %v2733_v62 = vadd.f32 %v2732_v27, %v2692_v50 }
 0x2ad   :  { %v2694_v39 = vpop.f32.mrf.mxu0 }
 0x2ae   :  { %v2735_v42 = vpop.f32.mrf.mxu1 }
 0x2e7   :  { %v2771_v61 = vpop.f32.mrf.mxu0 }
 0x2e8   :  { %v2772_v63 = vadd.f32 %v2771_v61, %v2731_v53  ;;  %v2812_v2 = vpop.f32.mrf.mxu1 }
 0x2e9   :  { %v2773_v7 = vpop.f32.mrf.mxu0 }
 0x2ea   :  { %v2774_v30 = vadd.f32 %v2773_v7, %v2733_v62  ;;  %v2814_v31 = vpop.f32.mrf.mxu1  ;;  %v2813_v37 = vadd.f32 %v2812_v2, %v2772_v63 }
 0x2eb   :  { %v2775_v32 = vpop.f32.mrf.mxu0 }
 0x2ec   :  { %v2815_v45 = vadd.f32 %v2814_v31, %v2774_v30  ;;  %v2816_v46 = vpop.f32.mrf.mxu1 }
 0x2ed   :  { %v2776_v49 = vpop.f32.mrf.mxu0 }
 0x2ee   :  { %v2821_v56 = vcombine.low %v2813_v37, %v2815_v45  ;;  %v2817_v57 = vpop.f32.mrf.mxu1 }
 0x2f0   :  { %3115 = vst.sshfl [vmem:[#allocation8] sm:$0x33 pattern:$0x76325410] %v2821_v56 }
 0x2f1   :  { %3925 = shalt.err (!%p3922_p5)
}
 0x2f2   :  { %2840 = dma.vmem_to_hbm [thread:$0]  %s2838_s2, 64, %s4436_s3, [#allocation4]  }
 0x2f3   :  { %3938 = dma.done.wait [#allocation4], 64  }
 0x2f4   :  { %3939 = vsyncadd [#allocation4], 4294967232 }
 0x2f5   :  { %2844 = vsyncpa [#allocation3], 1 }
 0x2f6   :  { %2845 = vsyncpa [#allocation6], 1 }
 0x2f7   :  { %2846 = vsyncpa [#allocation4], 1 }

</bundles_post_ra>
